<compile_context>
chip_gen: v5e
topology: v5e:2x2
jax: 0.10.0
libtpu: 0.0.40
codegen_flags: <defaults>
</compile_context>

<pallas_src>
import functools

import jax
import jax.numpy as jnp
from jax.experimental import pallas as pl
from jax.experimental.pallas import tpu as pltpu

EPS = 1.1920928955078125e-07  # torch.finfo(float32).eps, used by nn.RMSNorm(eps=None)
THETA = 10000.0


def _rmsnorm(x, w):
    ms = jnp.mean(x * x, axis=-1, keepdims=True)
    return x * jax.lax.rsqrt(ms + EPS) * w


# ----------------------------------------------------------------------------
# Pallas kernel: full block forward for one batch element.
# ----------------------------------------------------------------------------
def mha_kernel(x_ref, mask_ref, cos_ref, sin_ref,
               n1_ref, n2_ref,
               wqkv_ref, bqkv_ref,
               wo_ref, bo_ref,
               wf1_ref, bf1_ref, wf2_ref, bf2_ref,
               out_ref, o_scr, *, n_heads, head_dim):
    E = x_ref.shape[2]
    D = head_dim
    Dh = D // 2
    E2 = E // 2

    x = x_ref[0]                                   # (S, E) f32
    xn = _rmsnorm(x, n1_ref[...])                  # RMSNorm #1 (f32)
    xn_b = xn.astype(jnp.bfloat16)

    # ---- fused QKV projection: one wide bf16 MXU matmul + one fused bias add
    # (softmax 1/sqrt(D) already folded into the q columns host-side)
    qkv = jnp.dot(xn_b, wqkv_ref[...], preferred_element_type=jnp.float32)
    qkv = qkv + bqkv_ref[...]                      # (S, 3E) f32

    cos = cos_ref[...]                             # (S, E/2) f32, per-head tiled
    sin = sin_ref[...]
    mask = mask_ref[...]                           # (S, S) additive f32, shared

    # ---- RoPE hoisted out of the head loop: rotate whole [even|odd] slabs once
    qe, qo = qkv[:, 0:E2], qkv[:, E2:E]
    ke, ko = qkv[:, E:E + E2], qkv[:, E + E2:2 * E]
    qa = (qe * cos - qo * sin).astype(jnp.bfloat16)    # (S, E/2) bf16
    qb = (qe * sin + qo * cos).astype(jnp.bfloat16)
    ka = (ke * cos - ko * sin).astype(jnp.bfloat16)
    kb = (ke * sin + ko * cos).astype(jnp.bfloat16)
    v = qkv[:, 2 * E:3 * E].astype(jnp.bfloat16)       # cast once, not per head

    dnums = (((1,), (1,)), ((), ()))               # contract last dim of both
    for h in range(n_heads):                       # static loop: attention core
        lo, hi = h * Dh, (h + 1) * Dh
        # scores as two half-width bf16 matmuls (== full-D dot, no concatenate)
        s = (jax.lax.dot_general(qa[:, lo:hi], ka[:, lo:hi], dnums,
                                 preferred_element_type=jnp.float32)
             + jax.lax.dot_general(qb[:, lo:hi], kb[:, lo:hi], dnums,
                                   preferred_element_type=jnp.float32))
        s = s + mask

        # softmax with deferred normalization (1/l applied after p @ v)
        m = jnp.max(s, axis=-1, keepdims=True)
        p = jnp.exp(s - m)
        l = jnp.sum(p, axis=-1, keepdims=True)
        oh = jnp.dot(p.astype(jnp.bfloat16), v[:, h * D:(h + 1) * D],
                     preferred_element_type=jnp.float32)
        oh = oh * pl.reciprocal(l, approx=False)   # exact; approx gains nothing
        # head output straight into the VMEM scratch slab (no list/concatenate)
        o_scr[:, h * D:(h + 1) * D] = oh.astype(jnp.bfloat16)

    # ---- fused output projection on the concatenated heads (one wide matmul)
    attn = jnp.dot(o_scr[...], wo_ref[...],
                   preferred_element_type=jnp.float32) + bo_ref[...]

    # residual adds the RMSNorm-ed input; this matches the PyTorch module:
    #   x = n1(x); attn = attention(x, mask); x = n2(attn + x)
    y = _rmsnorm(attn + xn, n2_ref[...])           # RMSNorm #2

    # ---- FeedForward: fc2(SiLU(fc1(y))), bf16 matmuls / f32 accumulate
    h1 = jnp.dot(y.astype(jnp.bfloat16), wf1_ref[...],
                 preferred_element_type=jnp.float32) + bf1_ref[...]
    h1 = h1 * jax.nn.sigmoid(h1)                   # SiLU via EUP logistic
    out = jnp.dot(h1.astype(jnp.bfloat16), wf2_ref[...],
                  preferred_element_type=jnp.float32) + bf2_ref[...]
    out_ref[0] = out                               # one wide lane-dense store


# ----------------------------------------------------------------------------
# RoPE table (faithful to precompute_freqs_cis: dim = n_heads (!), and the
# original operator precedence: freqs = 1 / (theta**idx / dim)).
# ----------------------------------------------------------------------------
def rope_tables(n_heads, head_dim, seq_len, max_len):
    Dh = head_dim // 2
    idx = jnp.arange(0, n_heads, 2, dtype=jnp.float32)[: n_heads // 2]
    freqs = 1.0 / (THETA ** idx / n_heads)
    t = jnp.arange(max_len, dtype=jnp.float32)
    f = jnp.outer(t, freqs)                        # (max_len, n_heads//2)
    pos = jnp.minimum(jnp.arange(seq_len), max_len - 1)
    cos = jnp.cos(f)[pos]
    sin = jnp.sin(f)[pos]                          # (S, n_heads//2)
    if Dh > cos.shape[-1]:
        rf = Dh // cos.shape[-1]
        cos = jnp.repeat(cos, rf, axis=-1)         # == torch.repeat_interleave
        sin = jnp.repeat(sin, rf, axis=-1)
    return cos, sin                                # (S, Dh)


def _vmem_limit_bytes():
    """Generation-aware VMEM limit: 3/4 of physical (v7x 64 MiB -> 48 MiB,
    v5e/v6e 128 MiB -> 96 MiB) instead of a hardcoded constant."""
    cap = 64 * 1024 * 1024                         # conservative fallback (v7x)
    try:
        cap = int(pltpu.get_tpu_info().vmem_capacity_bytes)
    except Exception:
        pass
    return (3 * cap) // 4


# ----------------------------------------------------------------------------
# Wrapper: parameter re-layout (fused QKV, bf16 weights, folded scale,
# even/odd slab permutation) + pallas_call
# ----------------------------------------------------------------------------
def multi_head_attn_pallas(x, mask, p, *, n_heads, max_len,
                           single_buffer_weights=True):
    B, S, E = x.shape
    D = E // n_heads
    Dh = D // 2
    E2 = E // 2
    Fd = p["wf1"].shape[0]
    assert mask.ndim == 2 and mask.shape == (S, S), "expects a shared (S,S) mask"

    cos, sin = rope_tables(n_heads, D, S, max_len)          # (S, Dh)
    cos_t = jnp.tile(cos, (1, n_heads))                     # (S, E/2) per-head tiled
    sin_t = jnp.tile(sin, (1, n_heads))

    # q/k output permutation: [all-heads-even | all-heads-odd]
    even = (jnp.arange(n_heads)[:, None] * D
            + 2 * jnp.arange(Dh)[None, :]).reshape(-1)
    perm = jnp.concatenate([even, even + 1])                # (E,)

    scale = 1.0 / (D ** 0.5)                                # folded into q
    wdt = jnp.bfloat16
    wqkv = jnp.concatenate(
        [p["wq"][perm].T * scale, p["wk"][perm].T, p["wv"].T],
        axis=1).astype(wdt)                                 # (E, 3E) input-major
    bqkv = jnp.concatenate(
        [p["bq"][perm] * scale, p["bk"][perm], p["bv"]]).reshape(1, 3 * E)

    wo = p["wo"].T.astype(wdt)                              # (E, E)
    bo = p["bo"].reshape(1, E)
    n1 = p["n1"].reshape(1, E)
    n2 = p["n2"].reshape(1, E)
    wf1 = p["wf1"].T.astype(wdt)                            # (E, Fd)
    bf1 = p["bf1"].reshape(1, Fd)
    wf2 = p["wf2"].T.astype(wdt)                            # (Fd, E)
    bf2 = p["bf2"].reshape(1, E)

    def const_spec(shape):
        idx = lambda *_: (0,) * len(shape)
        if single_buffer_weights:
            try:
                # constant index -> no double buffering, half the VMEM footprint
                return pl.BlockSpec(shape, idx, pipeline_mode=pl.Buffered(1))
            except (AttributeError, TypeError, ValueError):
                pass
        return pl.BlockSpec(shape, idx)

    in_specs = [
        pl.BlockSpec((1, S, E), lambda b: (b, 0, 0)),       # x (batch-indexed)
        const_spec((S, S)),                                 # mask (shared, no B copy)
        const_spec((S, E2)), const_spec((S, E2)),           # cos, sin (tiled)
        const_spec((1, E)), const_spec((1, E)),             # n1, n2
        const_spec((E, 3 * E)), const_spec((1, 3 * E)),     # wqkv, bqkv
        const_spec((E, E)), const_spec((1, E)),             # wo, bo
        const_spec((E, Fd)), const_spec((1, Fd)),           # wf1, bf1
        const_spec((Fd, E)), const_spec((1, E)),            # wf2, bf2
    ]

    kernel = functools.partial(mha_kernel, n_heads=n_heads, head_dim=D)

    return pl.pallas_call(
        kernel,
        out_shape=jax.ShapeDtypeStruct((B, S, E), jnp.float32),
        grid_spec=pltpu.PrefetchScalarGridSpec(
            num_scalar_prefetch=0,
            grid=(B,),
            in_specs=in_specs,
            out_specs=pl.BlockSpec((1, S, E), lambda b: (b, 0, 0)),
            scratch_shapes=[pltpu.VMEM((S, E), jnp.bfloat16)],   # head outputs
        ),
        compiler_params=pltpu.CompilerParams(
            dimension_semantics=("parallel",),      # batch elements independent
            vmem_limit_bytes=_vmem_limit_bytes(),
        ),
    )(x, mask, cos_t, sin_t, n1, n2, wqkv, bqkv, wo, bo, wf1, bf1, wf2, bf2)


# ----------------------------------------------------------------------------
# Pure-JAX reference (original interleaved RoPE layout, f32) for validation
# ----------------------------------------------------------------------------
def ref_forward(x, mask, p, *, n_heads, max_len):
    B, S, E = x.shape
    D = E // n_heads
    Dh = D // 2

    def rms(v, w):
        return v * jax.lax.rsqrt(jnp.mean(v * v, -1, keepdims=True) + EPS) * w

    def linear(v, w, b):
        return v @ w.T + b

    xn = rms(x, p["n1"])
    q = linear(xn, p["wq"], p["bq"]).reshape(B, S, n_heads, D).transpose(0, 2, 1, 3)
    k = linear(xn, p["wk"], p["bk"]).reshape(B, S, n_heads, D).transpose(0, 2, 1, 3)
    v = linear(xn, p["wv"], p["bv"]).reshape(B, S, n_heads, D).transpose(0, 2, 1, 3)

    cos, sin = rope_tables(n_heads, D, S, max_len)

    def rope(a):
        ar = a.reshape(B, n_heads, S, Dh, 2)
        a1, a2 = ar[..., 0], ar[..., 1]
        c, s = cos[None, None], sin[None, None]
        out = jnp.stack([a1 * c - a2 * s, a1 * s + a2 * c], -1)
        return out.reshape(B, n_heads, S, D)

    q, k = rope(q), rope(k)
    scale = 1.0 / (D ** 0.5)
    sc = jnp.einsum("bhqd,bhkd->bhqk", q, k) * scale + mask[None, None]
    pr = jax.nn.softmax(sc, -1)
    o = jnp.einsum("bhqk,bhkd->bhqd", pr, v).transpose(0, 2, 1, 3).reshape(B, S, E)
    o = linear(o, p["wo"], p["bo"])
    y = rms(o + xn, p["n2"])
    h1 = linear(y, p["wf1"], p["bf1"])
    h1 = h1 * jax.nn.sigmoid(h1)
    return linear(h1, p["wf2"], p["bf2"])


# ----------------------------------------------------------------------------
# Deterministic parameter init (shapes match the nn.Module __init__)
# ----------------------------------------------------------------------------
def init_params(key, n_embd, ff_dim):
    ks = jax.random.split(key, 8)

    def lin(k, out_dim, in_dim):
        kw, kb = jax.random.split(k)
        w = jax.random.normal(kw, (out_dim, in_dim), jnp.float32) * 0.05
        b = jax.random.normal(kb, (out_dim,), jnp.float32) * 0.05
        return w, b

    p = {}
    p["wq"], p["bq"] = lin(ks[0], n_embd, n_embd)
    p["wk"], p["bk"] = lin(ks[1], n_embd, n_embd)
    p["wv"], p["bv"] = lin(ks[2], n_embd, n_embd)
    p["wo"], p["bo"] = lin(ks[3], n_embd, n_embd)
    p["wf1"], p["bf1"] = lin(ks[4], ff_dim, n_embd)
    p["wf2"], p["bf2"] = lin(ks[5], n_embd, ff_dim)
    p["n1"] = 1.0 + 0.05 * jax.random.normal(ks[6], (n_embd,), jnp.float32)
    p["n2"] = 1.0 + 0.05 * jax.random.normal(ks[7], (n_embd,), jnp.float32)
    return p


if __name__ == "__main__":
    n_embd, n_heads, ff_dim, max_len = 32, 4, 64, 16
    B, S = 2, 8

    key = jax.random.PRNGKey(0)
    kx, kp = jax.random.split(key)
    x = jax.random.normal(kx, (B, S, n_embd), jnp.float32)
    params = init_params(kp, n_embd, ff_dim)

    # additive causal mask shared across batch & heads: one (S,S) table, no
    # (B,S,S) materialization / DMA.
    mask = jnp.where(jnp.tril(jnp.ones((S, S), bool)), 0.0, -1e9).astype(jnp.float32)

    run = functools.partial(multi_head_attn_pallas, x, mask, params,
                            n_heads=n_heads, max_len=max_len)
    try:
        out = jax.block_until_ready(run(single_buffer_weights=True))
    except Exception:
        # pl.Buffered(1) not accepted by this jax/Mosaic build -> default specs.
        out = jax.block_until_ready(run(single_buffer_weights=False))

    ref = jax.block_until_ready(ref_forward(x, mask, params,
                                            n_heads=n_heads, max_len=max_len))
    assert out.shape == (B, S, n_embd)
    # bf16 matmul operands -> slightly loose tolerance vs. the f32 reference
    assert jnp.allclose(out, ref, atol=2e-2, rtol=2e-2), float(jnp.max(jnp.abs(out - ref)))

    print("KERNEL_OK")
</pallas_src>

<mosaic_0001>
module attributes {stable_mosaic.version = 11 : i64} {
  func.func @mha_kernel(%arg0: i32, %arg1: memref<1x8x32xf32, #tpu.memory_space<vmem>>, %arg2: memref<8x8xf32, #tpu.memory_space<vmem>>, %arg3: memref<8x16xf32, #tpu.memory_space<vmem>>, %arg4: memref<8x16xf32, #tpu.memory_space<vmem>>, %arg5: memref<1x32xf32, #tpu.memory_space<vmem>>, %arg6: memref<1x32xf32, #tpu.memory_space<vmem>>, %arg7: memref<32x96xbf16, #tpu.memory_space<vmem>>, %arg8: memref<1x96xf32, #tpu.memory_space<vmem>>, %arg9: memref<32x32xbf16, #tpu.memory_space<vmem>>, %arg10: memref<1x32xf32, #tpu.memory_space<vmem>>, %arg11: memref<32x64xbf16, #tpu.memory_space<vmem>>, %arg12: memref<1x64xf32, #tpu.memory_space<vmem>>, %arg13: memref<64x32xbf16, #tpu.memory_space<vmem>>, %arg14: memref<1x32xf32, #tpu.memory_space<vmem>>, %arg15: memref<1x8x32xf32, #tpu.memory_space<vmem>>, %arg16: memref<8x32xbf16, #tpu.memory_space<vmem>>) attributes {dimension_semantics = [#tpu.dimension_semantics<parallel>], iteration_bounds = array<i64: 2>, scalar_prefetch = 0 : i64, scratch_operands = 1 : i64, tpu.core_type = #tpu.core_type<tc>, window_params = [{transform_indices = @transform_0, window_bounds = array<i64: 1, 8, 32>}, {pipeline_mode = #tpu.pipeline_mode<synchronous>, transform_indices = @transform_1, window_bounds = array<i64: 8, 8>}, {pipeline_mode = #tpu.pipeline_mode<synchronous>, transform_indices = @transform_2, window_bounds = array<i64: 8, 16>}, {pipeline_mode = #tpu.pipeline_mode<synchronous>, transform_indices = @transform_3, window_bounds = array<i64: 8, 16>}, {pipeline_mode = #tpu.pipeline_mode<synchronous>, transform_indices = @transform_4, window_bounds = array<i64: 1, 32>}, {pipeline_mode = #tpu.pipeline_mode<synchronous>, transform_indices = @transform_5, window_bounds = array<i64: 1, 32>}, {pipeline_mode = #tpu.pipeline_mode<synchronous>, transform_indices = @transform_6, window_bounds = array<i64: 32, 96>}, {pipeline_mode = #tpu.pipeline_mode<synchronous>, transform_indices = @transform_7, window_bounds = array<i64: 1, 96>}, {pipeline_mode = #tpu.pipeline_mode<synchronous>, transform_indices = @transform_8, window_bounds = array<i64: 32, 32>}, {pipeline_mode = #tpu.pipeline_mode<synchronous>, transform_indices = @transform_9, window_bounds = array<i64: 1, 32>}, {pipeline_mode = #tpu.pipeline_mode<synchronous>, transform_indices = @transform_10, window_bounds = array<i64: 32, 64>}, {pipeline_mode = #tpu.pipeline_mode<synchronous>, transform_indices = @transform_11, window_bounds = array<i64: 1, 64>}, {pipeline_mode = #tpu.pipeline_mode<synchronous>, transform_indices = @transform_12, window_bounds = array<i64: 64, 32>}, {pipeline_mode = #tpu.pipeline_mode<synchronous>, transform_indices = @transform_13, window_bounds = array<i64: 1, 32>}, {transform_indices = @transform_14, window_bounds = array<i64: 1, 8, 32>}]} {
    %c0 = arith.constant 0 : index
    %c0_0 = arith.constant 0 : index
    %c0_1 = arith.constant 0 : index
    %0 = vector.load %arg1[%c0, %c0_0, %c0_1] : memref<1x8x32xf32, #tpu.memory_space<vmem>>, vector<1x8x32xf32>
    %1 = vector.shape_cast %0 : vector<1x8x32xf32> to vector<8x32xf32>
    %c0_2 = arith.constant 0 : index
    %c0_3 = arith.constant 0 : index
    %2 = vector.load %arg5[%c0_2, %c0_3] : memref<1x32xf32, #tpu.memory_space<vmem>>, vector<1x32xf32>
    %3 = arith.mulf %1, %1 : vector<8x32xf32>
    %cst = arith.constant dense<0.000000e+00> : vector<8xf32>
    %4 = vector.multi_reduction <add>, %3, %cst [1] : vector<8x32xf32> to vector<8xf32>
    %5 = vector.shape_cast %4 : vector<8xf32> to vector<8x1xf32>
    %cst_4 = arith.constant 3.200000e+01 : f32
    %6 = vector.broadcast %cst_4 : f32 to vector<8x1xf32>
    %7 = arith.divf %5, %6 : vector<8x1xf32>
    %cst_5 = arith.constant 1.1920929E-7 : f32
    %8 = vector.broadcast %cst_5 : f32 to vector<8x1xf32>
    %9 = arith.addf %7, %8 : vector<8x1xf32>
    %10 = math.rsqrt %9 : vector<8x1xf32>
    %11 = vector.broadcast %10 : vector<8x1xf32> to vector<8x32xf32>
    %12 = arith.mulf %1, %11 : vector<8x32xf32>
    %13 = vector.broadcast %2 : vector<1x32xf32> to vector<8x32xf32>
    %14 = arith.mulf %12, %13 : vector<8x32xf32>
    %15 = arith.truncf %14 : vector<8x32xf32> to vector<8x32xbf16>
    %c0_6 = arith.constant 0 : index
    %c0_7 = arith.constant 0 : index
    %16 = vector.load %arg7[%c0_6, %c0_7] : memref<32x96xbf16, #tpu.memory_space<vmem>>, vector<32x96xbf16>
    %cst_8 = arith.constant dense<0.000000e+00> : vector<8x96xf32>
    %17 = tpu.matmul %15, %16, %cst_8 {dimension_numbers = #tpu.dot_dimension_numbers<[1], [0], [0], [1], [0, 0, 1, 1], [], []>} : vector<8x32xbf16>, vector<32x96xbf16>, vector<8x96xf32> -> vector<8x96xf32>
    %c0_9 = arith.constant 0 : index
    %c0_10 = arith.constant 0 : index
    %18 = vector.load %arg8[%c0_9, %c0_10] : memref<1x96xf32, #tpu.memory_space<vmem>>, vector<1x96xf32>
    %19 = vector.broadcast %18 : vector<1x96xf32> to vector<8x96xf32>
    %20 = arith.addf %17, %19 : vector<8x96xf32>
    %c0_11 = arith.constant 0 : index
    %c0_12 = arith.constant 0 : index
    %21 = vector.load %arg3[%c0_11, %c0_12] : memref<8x16xf32, #tpu.memory_space<vmem>>, vector<8x16xf32>
    %c0_13 = arith.constant 0 : index
    %c0_14 = arith.constant 0 : index
    %22 = vector.load %arg4[%c0_13, %c0_14] : memref<8x16xf32, #tpu.memory_space<vmem>>, vector<8x16xf32>
    %c0_15 = arith.constant 0 : index
    %c0_16 = arith.constant 0 : index
    %23 = vector.load %arg2[%c0_15, %c0_16] : memref<8x8xf32, #tpu.memory_space<vmem>>, vector<8x8xf32>
    %24 = vector.extract_strided_slice %20 {offsets = [0, 0], sizes = [8, 16], strides = [1, 1]} : vector<8x96xf32> to vector<8x16xf32>
    %25 = vector.extract_strided_slice %20 {offsets = [0, 16], sizes = [8, 16], strides = [1, 1]} : vector<8x96xf32> to vector<8x16xf32>
    %26 = vector.extract_strided_slice %20 {offsets = [0, 32], sizes = [8, 16], strides = [1, 1]} : vector<8x96xf32> to vector<8x16xf32>
    %27 = vector.extract_strided_slice %20 {offsets = [0, 48], sizes = [8, 16], strides = [1, 1]} : vector<8x96xf32> to vector<8x16xf32>
    %28 = arith.mulf %24, %21 : vector<8x16xf32>
    %29 = arith.mulf %25, %22 : vector<8x16xf32>
    %30 = arith.subf %28, %29 : vector<8x16xf32>
    %31 = arith.truncf %30 : vector<8x16xf32> to vector<8x16xbf16>
    %32 = arith.mulf %24, %22 : vector<8x16xf32>
    %33 = arith.mulf %25, %21 : vector<8x16xf32>
    %34 = arith.addf %32, %33 : vector<8x16xf32>
    %35 = arith.truncf %34 : vector<8x16xf32> to vector<8x16xbf16>
    %36 = arith.mulf %26, %21 : vector<8x16xf32>
    %37 = arith.mulf %27, %22 : vector<8x16xf32>
    %38 = arith.subf %36, %37 : vector<8x16xf32>
    %39 = arith.truncf %38 : vector<8x16xf32> to vector<8x16xbf16>
    %40 = arith.mulf %26, %22 : vector<8x16xf32>
    %41 = arith.mulf %27, %21 : vector<8x16xf32>
    %42 = arith.addf %40, %41 : vector<8x16xf32>
    %43 = arith.truncf %42 : vector<8x16xf32> to vector<8x16xbf16>
    %44 = vector.extract_strided_slice %20 {offsets = [0, 64], sizes = [8, 32], strides = [1, 1]} : vector<8x96xf32> to vector<8x32xf32>
    %45 = arith.truncf %44 : vector<8x32xf32> to vector<8x32xbf16>
    %46 = vector.extract_strided_slice %31 {offsets = [0, 0], sizes = [8, 4], strides = [1, 1]} : vector<8x16xbf16> to vector<8x4xbf16>
    %47 = vector.extract_strided_slice %39 {offsets = [0, 0], sizes = [8, 4], strides = [1, 1]} : vector<8x16xbf16> to vector<8x4xbf16>
    %cst_17 = arith.constant dense<0.000000e+00> : vector<8x8xf32>
    %48 = tpu.matmul %46, %47, %cst_17 {dimension_numbers = #tpu.dot_dimension_numbers<[1], [1], [0], [0], [0, 0, 1, 0], [], []>} : vector<8x4xbf16>, vector<8x4xbf16>, vector<8x8xf32> -> vector<8x8xf32>
    %49 = vector.extract_strided_slice %35 {offsets = [0, 0], sizes = [8, 4], strides = [1, 1]} : vector<8x16xbf16> to vector<8x4xbf16>
    %50 = vector.extract_strided_slice %43 {offsets = [0, 0], sizes = [8, 4], strides = [1, 1]} : vector<8x16xbf16> to vector<8x4xbf16>
    %cst_18 = arith.constant dense<0.000000e+00> : vector<8x8xf32>
    %51 = tpu.matmul %49, %50, %cst_18 {dimension_numbers = #tpu.dot_dimension_numbers<[1], [1], [0], [0], [0, 0, 1, 0], [], []>} : vector<8x4xbf16>, vector<8x4xbf16>, vector<8x8xf32> -> vector<8x8xf32>
    %52 = arith.addf %48, %51 : vector<8x8xf32>
    %53 = arith.addf %52, %23 : vector<8x8xf32>
    %cst_19 = arith.constant dense<0xFF800000> : vector<8xf32>
    %54 = vector.multi_reduction <maximumf>, %53, %cst_19 [1] : vector<8x8xf32> to vector<8xf32>
    %55 = vector.shape_cast %54 : vector<8xf32> to vector<8x1xf32>
    %56 = vector.broadcast %55 : vector<8x1xf32> to vector<8x8xf32>
    %57 = arith.subf %53, %56 : vector<8x8xf32>
    %58 = math.exp %57 : vector<8x8xf32>
    %cst_20 = arith.constant dense<0.000000e+00> : vector<8xf32>
    %59 = vector.multi_reduction <add>, %58, %cst_20 [1] : vector<8x8xf32> to vector<8xf32>
    %60 = vector.shape_cast %59 : vector<8xf32> to vector<8x1xf32>
    %61 = arith.truncf %58 : vector<8x8xf32> to vector<8x8xbf16>
    %62 = vector.extract_strided_slice %45 {offsets = [0, 0], sizes = [8, 8], strides = [1, 1]} : vector<8x32xbf16> to vector<8x8xbf16>
    %cst_21 = arith.constant dense<0.000000e+00> : vector<8x8xf32>
    %63 = tpu.matmul %61, %62, %cst_21 {dimension_numbers = #tpu.dot_dimension_numbers<[1], [0], [0], [1], [0, 0, 1, 1], [], []>} : vector<8x8xbf16>, vector<8x8xbf16>, vector<8x8xf32> -> vector<8x8xf32>
    %64 = tpu.reciprocal %60 : vector<8x1xf32> -> vector<8x1xf32>
    %65 = vector.broadcast %64 : vector<8x1xf32> to vector<8x8xf32>
    %66 = arith.mulf %63, %65 : vector<8x8xf32>
    %67 = arith.truncf %66 : vector<8x8xf32> to vector<8x8xbf16>
    %c0_22 = arith.constant 0 : index
    %c0_23 = arith.constant 0 : index
    %68 = vector.load %arg16[%c0_22, %c0_23] : memref<8x32xbf16, #tpu.memory_space<vmem>>, vector<8x8xbf16>
    tpu.vector_store %arg16[%c0_22, %c0_23], %67 {strides = array<i32>} : memref<8x32xbf16, #tpu.memory_space<vmem>>, vector<8x8xbf16>,
    %69 = vector.extract_strided_slice %31 {offsets = [0, 4], sizes = [8, 4], strides = [1, 1]} : vector<8x16xbf16> to vector<8x4xbf16>
    %70 = vector.extract_strided_slice %39 {offsets = [0, 4], sizes = [8, 4], strides = [1, 1]} : vector<8x16xbf16> to vector<8x4xbf16>
    %cst_24 = arith.constant dense<0.000000e+00> : vector<8x8xf32>
    %71 = tpu.matmul %69, %70, %cst_24 {dimension_numbers = #tpu.dot_dimension_numbers<[1], [1], [0], [0], [0, 0, 1, 0], [], []>} : vector<8x4xbf16>, vector<8x4xbf16>, vector<8x8xf32> -> vector<8x8xf32>
    %72 = vector.extract_strided_slice %35 {offsets = [0, 4], sizes = [8, 4], strides = [1, 1]} : vector<8x16xbf16> to vector<8x4xbf16>
    %73 = vector.extract_strided_slice %43 {offsets = [0, 4], sizes = [8, 4], strides = [1, 1]} : vector<8x16xbf16> to vector<8x4xbf16>
    %cst_25 = arith.constant dense<0.000000e+00> : vector<8x8xf32>
    %74 = tpu.matmul %72, %73, %cst_25 {dimension_numbers = #tpu.dot_dimension_numbers<[1], [1], [0], [0], [0, 0, 1, 0], [], []>} : vector<8x4xbf16>, vector<8x4xbf16>, vector<8x8xf32> -> vector<8x8xf32>
    %75 = arith.addf %71, %74 : vector<8x8xf32>
    %76 = arith.addf %75, %23 : vector<8x8xf32>
    %cst_26 = arith.constant dense<0xFF800000> : vector<8xf32>
    %77 = vector.multi_reduction <maximumf>, %76, %cst_26 [1] : vector<8x8xf32> to vector<8xf32>
    %78 = vector.shape_cast %77 : vector<8xf32> to vector<8x1xf32>
    %79 = vector.broadcast %78 : vector<8x1xf32> to vector<8x8xf32>
    %80 = arith.subf %76, %79 : vector<8x8xf32>
    %81 = math.exp %80 : vector<8x8xf32>
    %cst_27 = arith.constant dense<0.000000e+00> : vector<8xf32>
    %82 = vector.multi_reduction <add>, %81, %cst_27 [1] : vector<8x8xf32> to vector<8xf32>
    %83 = vector.shape_cast %82 : vector<8xf32> to vector<8x1xf32>
    %84 = arith.truncf %81 : vector<8x8xf32> to vector<8x8xbf16>
    %85 = vector.extract_strided_slice %45 {offsets = [0, 8], sizes = [8, 8], strides = [1, 1]} : vector<8x32xbf16> to vector<8x8xbf16>
    %cst_28 = arith.constant dense<0.000000e+00> : vector<8x8xf32>
    %86 = tpu.matmul %84, %85, %cst_28 {dimension_numbers = #tpu.dot_dimension_numbers<[1], [0], [0], [1], [0, 0, 1, 1], [], []>} : vector<8x8xbf16>, vector<8x8xbf16>, vector<8x8xf32> -> vector<8x8xf32>
    %87 = tpu.reciprocal %83 : vector<8x1xf32> -> vector<8x1xf32>
    %88 = vector.broadcast %87 : vector<8x1xf32> to vector<8x8xf32>
    %89 = arith.mulf %86, %88 : vector<8x8xf32>
    %90 = arith.truncf %89 : vector<8x8xf32> to vector<8x8xbf16>
    %c0_29 = arith.constant 0 : index
    %c8 = arith.constant 8 : index
    %91 = vector.load %arg16[%c0_29, %c8] : memref<8x32xbf16, #tpu.memory_space<vmem>>, vector<8x8xbf16>
    tpu.vector_store %arg16[%c0_29, %c8], %90 {strides = array<i32>} : memref<8x32xbf16, #tpu.memory_space<vmem>>, vector<8x8xbf16>,
    %92 = vector.extract_strided_slice %31 {offsets = [0, 8], sizes = [8, 4], strides = [1, 1]} : vector<8x16xbf16> to vector<8x4xbf16>
    %93 = vector.extract_strided_slice %39 {offsets = [0, 8], sizes = [8, 4], strides = [1, 1]} : vector<8x16xbf16> to vector<8x4xbf16>
    %cst_30 = arith.constant dense<0.000000e+00> : vector<8x8xf32>
    %94 = tpu.matmul %92, %93, %cst_30 {dimension_numbers = #tpu.dot_dimension_numbers<[1], [1], [0], [0], [0, 0, 1, 0], [], []>} : vector<8x4xbf16>, vector<8x4xbf16>, vector<8x8xf32> -> vector<8x8xf32>
    %95 = vector.extract_strided_slice %35 {offsets = [0, 8], sizes = [8, 4], strides = [1, 1]} : vector<8x16xbf16> to vector<8x4xbf16>
    %96 = vector.extract_strided_slice %43 {offsets = [0, 8], sizes = [8, 4], strides = [1, 1]} : vector<8x16xbf16> to vector<8x4xbf16>
    %cst_31 = arith.constant dense<0.000000e+00> : vector<8x8xf32>
    %97 = tpu.matmul %95, %96, %cst_31 {dimension_numbers = #tpu.dot_dimension_numbers<[1], [1], [0], [0], [0, 0, 1, 0], [], []>} : vector<8x4xbf16>, vector<8x4xbf16>, vector<8x8xf32> -> vector<8x8xf32>
    %98 = arith.addf %94, %97 : vector<8x8xf32>
    %99 = arith.addf %98, %23 : vector<8x8xf32>
    %cst_32 = arith.constant dense<0xFF800000> : vector<8xf32>
    %100 = vector.multi_reduction <maximumf>, %99, %cst_32 [1] : vector<8x8xf32> to vector<8xf32>
    %101 = vector.shape_cast %100 : vector<8xf32> to vector<8x1xf32>
    %102 = vector.broadcast %101 : vector<8x1xf32> to vector<8x8xf32>
    %103 = arith.subf %99, %102 : vector<8x8xf32>
    %104 = math.exp %103 : vector<8x8xf32>
    %cst_33 = arith.constant dense<0.000000e+00> : vector<8xf32>
    %105 = vector.multi_reduction <add>, %104, %cst_33 [1] : vector<8x8xf32> to vector<8xf32>
    %106 = vector.shape_cast %105 : vector<8xf32> to vector<8x1xf32>
    %107 = arith.truncf %104 : vector<8x8xf32> to vector<8x8xbf16>
    %108 = vector.extract_strided_slice %45 {offsets = [0, 16], sizes = [8, 8], strides = [1, 1]} : vector<8x32xbf16> to vector<8x8xbf16>
    %cst_34 = arith.constant dense<0.000000e+00> : vector<8x8xf32>
    %109 = tpu.matmul %107, %108, %cst_34 {dimension_numbers = #tpu.dot_dimension_numbers<[1], [0], [0], [1], [0, 0, 1, 1], [], []>} : vector<8x8xbf16>, vector<8x8xbf16>, vector<8x8xf32> -> vector<8x8xf32>
    %110 = tpu.reciprocal %106 : vector<8x1xf32> -> vector<8x1xf32>
    %111 = vector.broadcast %110 : vector<8x1xf32> to vector<8x8xf32>
    %112 = arith.mulf %109, %111 : vector<8x8xf32>
    %113 = arith.truncf %112 : vector<8x8xf32> to vector<8x8xbf16>
    %c0_35 = arith.constant 0 : index
    %c16 = arith.constant 16 : index
    %114 = vector.load %arg16[%c0_35, %c16] : memref<8x32xbf16, #tpu.memory_space<vmem>>, vector<8x8xbf16>
    tpu.vector_store %arg16[%c0_35, %c16], %113 {strides = array<i32>} : memref<8x32xbf16, #tpu.memory_space<vmem>>, vector<8x8xbf16>,
    %115 = vector.extract_strided_slice %31 {offsets = [0, 12], sizes = [8, 4], strides = [1, 1]} : vector<8x16xbf16> to vector<8x4xbf16>
    %116 = vector.extract_strided_slice %39 {offsets = [0, 12], sizes = [8, 4], strides = [1, 1]} : vector<8x16xbf16> to vector<8x4xbf16>
    %cst_36 = arith.constant dense<0.000000e+00> : vector<8x8xf32>
    %117 = tpu.matmul %115, %116, %cst_36 {dimension_numbers = #tpu.dot_dimension_numbers<[1], [1], [0], [0], [0, 0, 1, 0], [], []>} : vector<8x4xbf16>, vector<8x4xbf16>, vector<8x8xf32> -> vector<8x8xf32>
    %118 = vector.extract_strided_slice %35 {offsets = [0, 12], sizes = [8, 4], strides = [1, 1]} : vector<8x16xbf16> to vector<8x4xbf16>
    %119 = vector.extract_strided_slice %43 {offsets = [0, 12], sizes = [8, 4], strides = [1, 1]} : vector<8x16xbf16> to vector<8x4xbf16>
    %cst_37 = arith.constant dense<0.000000e+00> : vector<8x8xf32>
    %120 = tpu.matmul %118, %119, %cst_37 {dimension_numbers = #tpu.dot_dimension_numbers<[1], [1], [0], [0], [0, 0, 1, 0], [], []>} : vector<8x4xbf16>, vector<8x4xbf16>, vector<8x8xf32> -> vector<8x8xf32>
    %121 = arith.addf %117, %120 : vector<8x8xf32>
    %122 = arith.addf %121, %23 : vector<8x8xf32>
    %cst_38 = arith.constant dense<0xFF800000> : vector<8xf32>
    %123 = vector.multi_reduction <maximumf>, %122, %cst_38 [1] : vector<8x8xf32> to vector<8xf32>
    %124 = vector.shape_cast %123 : vector<8xf32> to vector<8x1xf32>
    %125 = vector.broadcast %124 : vector<8x1xf32> to vector<8x8xf32>
    %126 = arith.subf %122, %125 : vector<8x8xf32>
    %127 = math.exp %126 : vector<8x8xf32>
    %cst_39 = arith.constant dense<0.000000e+00> : vector<8xf32>
    %128 = vector.multi_reduction <add>, %127, %cst_39 [1] : vector<8x8xf32> to vector<8xf32>
    %129 = vector.shape_cast %128 : vector<8xf32> to vector<8x1xf32>
    %130 = arith.truncf %127 : vector<8x8xf32> to vector<8x8xbf16>
    %131 = vector.extract_strided_slice %45 {offsets = [0, 24], sizes = [8, 8], strides = [1, 1]} : vector<8x32xbf16> to vector<8x8xbf16>
    %cst_40 = arith.constant dense<0.000000e+00> : vector<8x8xf32>
    %132 = tpu.matmul %130, %131, %cst_40 {dimension_numbers = #tpu.dot_dimension_numbers<[1], [0], [0], [1], [0, 0, 1, 1], [], []>} : vector<8x8xbf16>, vector<8x8xbf16>, vector<8x8xf32> -> vector<8x8xf32>
    %133 = tpu.reciprocal %129 : vector<8x1xf32> -> vector<8x1xf32>
    %134 = vector.broadcast %133 : vector<8x1xf32> to vector<8x8xf32>
    %135 = arith.mulf %132, %134 : vector<8x8xf32>
    %136 = arith.truncf %135 : vector<8x8xf32> to vector<8x8xbf16>
    %c0_41 = arith.constant 0 : index
    %c24 = arith.constant 24 : index
    %137 = vector.load %arg16[%c0_41, %c24] : memref<8x32xbf16, #tpu.memory_space<vmem>>, vector<8x8xbf16>
    tpu.vector_store %arg16[%c0_41, %c24], %136 {strides = array<i32>} : memref<8x32xbf16, #tpu.memory_space<vmem>>, vector<8x8xbf16>,
    %c0_42 = arith.constant 0 : index
    %c0_43 = arith.constant 0 : index
    %138 = vector.load %arg16[%c0_42, %c0_43] : memref<8x32xbf16, #tpu.memory_space<vmem>>, vector<8x32xbf16>
    %c0_44 = arith.constant 0 : index
    %c0_45 = arith.constant 0 : index
    %139 = vector.load %arg9[%c0_44, %c0_45] : memref<32x32xbf16, #tpu.memory_space<vmem>>, vector<32x32xbf16>
    %cst_46 = arith.constant dense<0.000000e+00> : vector<8x32xf32>
    %140 = tpu.matmul %138, %139, %cst_46 {dimension_numbers = #tpu.dot_dimension_numbers<[1], [0], [0], [1], [0, 0, 1, 1], [], []>} : vector<8x32xbf16>, vector<32x32xbf16>, vector<8x32xf32> -> vector<8x32xf32>
    %c0_47 = arith.constant 0 : index
    %c0_48 = arith.constant 0 : index
    %141 = vector.load %arg10[%c0_47, %c0_48] : memref<1x32xf32, #tpu.memory_space<vmem>>, vector<1x32xf32>
    %142 = vector.broadcast %141 : vector<1x32xf32> to vector<8x32xf32>
    %143 = arith.addf %140, %142 : vector<8x32xf32>
    %144 = arith.addf %143, %14 : vector<8x32xf32>
    %c0_49 = arith.constant 0 : index
    %c0_50 = arith.constant 0 : index
    %145 = vector.load %arg6[%c0_49, %c0_50] : memref<1x32xf32, #tpu.memory_space<vmem>>, vector<1x32xf32>
    %146 = arith.mulf %144, %144 : vector<8x32xf32>
    %cst_51 = arith.constant dense<0.000000e+00> : vector<8xf32>
    %147 = vector.multi_reduction <add>, %146, %cst_51 [1] : vector<8x32xf32> to vector<8xf32>
    %148 = vector.shape_cast %147 : vector<8xf32> to vector<8x1xf32>
    %cst_52 = arith.constant 3.200000e+01 : f32
    %149 = vector.broadcast %cst_52 : f32 to vector<8x1xf32>
    %150 = arith.divf %148, %149 : vector<8x1xf32>
    %cst_53 = arith.constant 1.1920929E-7 : f32
    %151 = vector.broadcast %cst_53 : f32 to vector<8x1xf32>
    %152 = arith.addf %150, %151 : vector<8x1xf32>
    %153 = math.rsqrt %152 : vector<8x1xf32>
    %154 = vector.broadcast %153 : vector<8x1xf32> to vector<8x32xf32>
    %155 = arith.mulf %144, %154 : vector<8x32xf32>
    %156 = vector.broadcast %145 : vector<1x32xf32> to vector<8x32xf32>
    %157 = arith.mulf %155, %156 : vector<8x32xf32>
    %158 = arith.truncf %157 : vector<8x32xf32> to vector<8x32xbf16>
    %c0_54 = arith.constant 0 : index
    %c0_55 = arith.constant 0 : index
    %159 = vector.load %arg11[%c0_54, %c0_55] : memref<32x64xbf16, #tpu.memory_space<vmem>>, vector<32x64xbf16>
    %cst_56 = arith.constant dense<0.000000e+00> : vector<8x64xf32>
    %160 = tpu.matmul %158, %159, %cst_56 {dimension_numbers = #tpu.dot_dimension_numbers<[1], [0], [0], [1], [0, 0, 1, 1], [], []>} : vector<8x32xbf16>, vector<32x64xbf16>, vector<8x64xf32> -> vector<8x64xf32>
    %c0_57 = arith.constant 0 : index
    %c0_58 = arith.constant 0 : index
    %161 = vector.load %arg12[%c0_57, %c0_58] : memref<1x64xf32, #tpu.memory_space<vmem>>, vector<1x64xf32>
    %162 = vector.broadcast %161 : vector<1x64xf32> to vector<8x64xf32>
    %163 = arith.addf %160, %162 : vector<8x64xf32>
    %164 = arith.negf %163 : vector<8x64xf32>
    %165 = math.exp %164 : vector<8x64xf32>
    %cst_59 = arith.constant 1.000000e+00 : f32
    %166 = vector.broadcast %cst_59 : f32 to vector<8x64xf32>
    %167 = arith.addf %166, %165 : vector<8x64xf32>
    %168 = arith.divf %166, %167 : vector<8x64xf32>
    %169 = arith.mulf %163, %168 : vector<8x64xf32>
    %170 = arith.truncf %169 : vector<8x64xf32> to vector<8x64xbf16>
    %c0_60 = arith.constant 0 : index
    %c0_61 = arith.constant 0 : index
    %171 = vector.load %arg13[%c0_60, %c0_61] : memref<64x32xbf16, #tpu.memory_space<vmem>>, vector<64x32xbf16>
    %cst_62 = arith.constant dense<0.000000e+00> : vector<8x32xf32>
    %172 = tpu.matmul %170, %171, %cst_62 {dimension_numbers = #tpu.dot_dimension_numbers<[1], [0], [0], [1], [0, 0, 1, 1], [], []>} : vector<8x64xbf16>, vector<64x32xbf16>, vector<8x32xf32> -> vector<8x32xf32>
    %c0_63 = arith.constant 0 : index
    %c0_64 = arith.constant 0 : index
    %173 = vector.load %arg14[%c0_63, %c0_64] : memref<1x32xf32, #tpu.memory_space<vmem>>, vector<1x32xf32>
    %174 = vector.broadcast %173 : vector<1x32xf32> to vector<8x32xf32>
    %175 = arith.addf %172, %174 : vector<8x32xf32>
    %c0_65 = arith.constant 0 : index
    %c0_66 = arith.constant 0 : index
    %c0_67 = arith.constant 0 : index
    %176 = vector.load %arg15[%c0_65, %c0_66, %c0_67] : memref<1x8x32xf32, #tpu.memory_space<vmem>>, vector<1x8x32xf32>
    %177 = vector.shape_cast %176 : vector<1x8x32xf32> to vector<8x32xf32>
    %178 = vector.shape_cast %175 : vector<8x32xf32> to vector<1x8x32xf32>
    tpu.vector_store %arg15[%c0_65, %c0_66, %c0_67], %178 {strides = array<i32>} : memref<1x8x32xf32, #tpu.memory_space<vmem>>, vector<1x8x32xf32>,
    return
  }
  func.func @transform_0(%arg0: i32) -> (i32, i32, i32) {
    %c0_i32 = arith.constant 0 : i32
    %c0_i32_0 = arith.constant 0 : i32
    %c0_i32_1 = arith.constant 0 : i32
    return %arg0, %c0_i32, %c0_i32_0 : i32, i32, i32
  }
  func.func @transform_1(%arg0: i32) -> (i32, i32) {
    %c0_i32 = arith.constant 0 : i32
    %c0_i32_0 = arith.constant 0 : i32
    %c0_i32_1 = arith.constant 0 : i32
    return %c0_i32, %c0_i32_0 : i32, i32
  }
  func.func @transform_2(%arg0: i32) -> (i32, i32) {
    %c0_i32 = arith.constant 0 : i32
    %c0_i32_0 = arith.constant 0 : i32
    %c0_i32_1 = arith.constant 0 : i32
    return %c0_i32, %c0_i32_0 : i32, i32
  }
  func.func @transform_3(%arg0: i32) -> (i32, i32) {
    %c0_i32 = arith.constant 0 : i32
    %c0_i32_0 = arith.constant 0 : i32
    %c0_i32_1 = arith.constant 0 : i32
    return %c0_i32, %c0_i32_0 : i32, i32
  }
  func.func @transform_4(%arg0: i32) -> (i32, i32) {
    %c0_i32 = arith.constant 0 : i32
    %c0_i32_0 = arith.constant 0 : i32
    %c0_i32_1 = arith.constant 0 : i32
    return %c0_i32, %c0_i32_0 : i32, i32
  }
  func.func @transform_5(%arg0: i32) -> (i32, i32) {
    %c0_i32 = arith.constant 0 : i32
    %c0_i32_0 = arith.constant 0 : i32
    %c0_i32_1 = arith.constant 0 : i32
    return %c0_i32, %c0_i32_0 : i32, i32
  }
  func.func @transform_6(%arg0: i32) -> (i32, i32) {
    %c0_i32 = arith.constant 0 : i32
    %c0_i32_0 = arith.constant 0 : i32
    %c0_i32_1 = arith.constant 0 : i32
    return %c0_i32, %c0_i32_0 : i32, i32
  }
  func.func @transform_7(%arg0: i32) -> (i32, i32) {
    %c0_i32 = arith.constant 0 : i32
    %c0_i32_0 = arith.constant 0 : i32
    %c0_i32_1 = arith.constant 0 : i32
    return %c0_i32, %c0_i32_0 : i32, i32
  }
  func.func @transform_8(%arg0: i32) -> (i32, i32) {
    %c0_i32 = arith.constant 0 : i32
    %c0_i32_0 = arith.constant 0 : i32
    %c0_i32_1 = arith.constant 0 : i32
    return %c0_i32, %c0_i32_0 : i32, i32
  }
  func.func @transform_9(%arg0: i32) -> (i32, i32) {
    %c0_i32 = arith.constant 0 : i32
    %c0_i32_0 = arith.constant 0 : i32
    %c0_i32_1 = arith.constant 0 : i32
    return %c0_i32, %c0_i32_0 : i32, i32
  }
  func.func @transform_10(%arg0: i32) -> (i32, i32) {
    %c0_i32 = arith.constant 0 : i32
    %c0_i32_0 = arith.constant 0 : i32
    %c0_i32_1 = arith.constant 0 : i32
    return %c0_i32, %c0_i32_0 : i32, i32
  }
  func.func @transform_11(%arg0: i32) -> (i32, i32) {
    %c0_i32 = arith.constant 0 : i32
    %c0_i32_0 = arith.constant 0 : i32
    %c0_i32_1 = arith.constant 0 : i32
    return %c0_i32, %c0_i32_0 : i32, i32
  }
  func.func @transform_12(%arg0: i32) -> (i32, i32) {
    %c0_i32 = arith.constant 0 : i32
    %c0_i32_0 = arith.constant 0 : i32
    %c0_i32_1 = arith.constant 0 : i32
    return %c0_i32, %c0_i32_0 : i32, i32
  }
  func.func @transform_13(%arg0: i32) -> (i32, i32) {
    %c0_i32 = arith.constant 0 : i32
    %c0_i32_0 = arith.constant 0 : i32
    %c0_i32_1 = arith.constant 0 : i32
    return %c0_i32, %c0_i32_0 : i32, i32
  }
  func.func @transform_14(%arg0: i32) -> (i32, i32, i32) {
    %c0_i32 = arith.constant 0 : i32
    %c0_i32_0 = arith.constant 0 : i32
    %c0_i32_1 = arith.constant 0 : i32
    return %arg0, %c0_i32, %c0_i32_0 : i32, i32, i32
  }
}

module attributes {stable_mosaic.version = 11 : i64} {
  func.func @mha_kernel(%arg0: i32, %arg1: memref<1x8x32xf32, #tpu.memory_space<vmem>>, %arg2: memref<8x8xf32, #tpu.memory_space<vmem>>, %arg3: memref<8x16xf32, #tpu.memory_space<vmem>>, %arg4: memref<8x16xf32, #tpu.memory_space<vmem>>, %arg5: memref<1x32xf32, #tpu.memory_space<vmem>>, %arg6: memref<1x32xf32, #tpu.memory_space<vmem>>, %arg7: memref<32x96xbf16, #tpu.memory_space<vmem>>, %arg8: memref<1x96xf32, #tpu.memory_space<vmem>>, %arg9: memref<32x32xbf16, #tpu.memory_space<vmem>>, %arg10: memref<1x32xf32, #tpu.memory_space<vmem>>, %arg11: memref<32x64xbf16, #tpu.memory_space<vmem>>, %arg12: memref<1x64xf32, #tpu.memory_space<vmem>>, %arg13: memref<64x32xbf16, #tpu.memory_space<vmem>>, %arg14: memref<1x32xf32, #tpu.memory_space<vmem>>, %arg15: memref<1x8x32xf32, #tpu.memory_space<vmem>>, %arg16: memref<8x32xbf16, #tpu.memory_space<vmem>>) attributes {dimension_semantics = [#tpu.dimension_semantics<parallel>], iteration_bounds = array<i64: 2>, scalar_prefetch = 0 : i64, scratch_operands = 1 : i64, tpu.core_type = #tpu.core_type<tc>, window_params = [{transform_indices = @transform_0, window_bounds = array<i64: 1, 8, 32>}, {pipeline_mode = #tpu.pipeline_mode<synchronous>, transform_indices = @transform_1, window_bounds = array<i64: 8, 8>}, {pipeline_mode = #tpu.pipeline_mode<synchronous>, transform_indices = @transform_2, window_bounds = array<i64: 8, 16>}, {pipeline_mode = #tpu.pipeline_mode<synchronous>, transform_indices = @transform_3, window_bounds = array<i64: 8, 16>}, {pipeline_mode = #tpu.pipeline_mode<synchronous>, transform_indices = @transform_4, window_bounds = array<i64: 1, 32>}, {pipeline_mode = #tpu.pipeline_mode<synchronous>, transform_indices = @transform_5, window_bounds = array<i64: 1, 32>}, {pipeline_mode = #tpu.pipeline_mode<synchronous>, transform_indices = @transform_6, window_bounds = array<i64: 32, 96>}, {pipeline_mode = #tpu.pipeline_mode<synchronous>, transform_indices = @transform_7, window_bounds = array<i64: 1, 96>}, {pipeline_mode = #tpu.pipeline_mode<synchronous>, transform_indices = @transform_8, window_bounds = array<i64: 32, 32>}, {pipeline_mode = #tpu.pipeline_mode<synchronous>, transform_indices = @transform_9, window_bounds = array<i64: 1, 32>}, {pipeline_mode = #tpu.pipeline_mode<synchronous>, transform_indices = @transform_10, window_bounds = array<i64: 32, 64>}, {pipeline_mode = #tpu.pipeline_mode<synchronous>, transform_indices = @transform_11, window_bounds = array<i64: 1, 64>}, {pipeline_mode = #tpu.pipeline_mode<synchronous>, transform_indices = @transform_12, window_bounds = array<i64: 64, 32>}, {pipeline_mode = #tpu.pipeline_mode<synchronous>, transform_indices = @transform_13, window_bounds = array<i64: 1, 32>}, {transform_indices = @transform_14, window_bounds = array<i64: 1, 8, 32>}]} {
    %c0 = arith.constant 0 : index
    %c0_0 = arith.constant 0 : index
    %c0_1 = arith.constant 0 : index
    %0 = vector.load %arg1[%c0, %c0_0, %c0_1] : memref<1x8x32xf32, #tpu.memory_space<vmem>>, vector<1x8x32xf32>
    %1 = vector.shape_cast %0 : vector<1x8x32xf32> to vector<8x32xf32>
    %c0_2 = arith.constant 0 : index
    %c0_3 = arith.constant 0 : index
    %2 = vector.load %arg5[%c0_2, %c0_3] : memref<1x32xf32, #tpu.memory_space<vmem>>, vector<1x32xf32>
    %3 = arith.mulf %1, %1 : vector<8x32xf32>
    %cst = arith.constant dense<0.000000e+00> : vector<8xf32>
    %4 = vector.multi_reduction <add>, %3, %cst [1] : vector<8x32xf32> to vector<8xf32>
    %5 = vector.shape_cast %4 : vector<8xf32> to vector<8x1xf32>
    %cst_4 = arith.constant 3.200000e+01 : f32
    %6 = vector.broadcast %cst_4 : f32 to vector<8x1xf32>
    %7 = arith.divf %5, %6 : vector<8x1xf32>
    %cst_5 = arith.constant 1.1920929E-7 : f32
    %8 = vector.broadcast %cst_5 : f32 to vector<8x1xf32>
    %9 = arith.addf %7, %8 : vector<8x1xf32>
    %10 = math.rsqrt %9 : vector<8x1xf32>
    %11 = vector.broadcast %10 : vector<8x1xf32> to vector<8x32xf32>
    %12 = arith.mulf %1, %11 : vector<8x32xf32>
    %13 = vector.broadcast %2 : vector<1x32xf32> to vector<8x32xf32>
    %14 = arith.mulf %12, %13 : vector<8x32xf32>
    %15 = arith.truncf %14 : vector<8x32xf32> to vector<8x32xbf16>
    %c0_6 = arith.constant 0 : index
    %c0_7 = arith.constant 0 : index
    %16 = vector.load %arg7[%c0_6, %c0_7] : memref<32x96xbf16, #tpu.memory_space<vmem>>, vector<32x96xbf16>
    %cst_8 = arith.constant dense<0.000000e+00> : vector<8x96xf32>
    %17 = tpu.matmul %15, %16, %cst_8 {dimension_numbers = #tpu.dot_dimension_numbers<[1], [0], [0], [1], [0, 0, 1, 1], [], []>} : vector<8x32xbf16>, vector<32x96xbf16>, vector<8x96xf32> -> vector<8x96xf32>
    %c0_9 = arith.constant 0 : index
    %c0_10 = arith.constant 0 : index
    %18 = vector.load %arg8[%c0_9, %c0_10] : memref<1x96xf32, #tpu.memory_space<vmem>>, vector<1x96xf32>
    %19 = vector.broadcast %18 : vector<1x96xf32> to vector<8x96xf32>
    %20 = arith.addf %17, %19 : vector<8x96xf32>
    %c0_11 = arith.constant 0 : index
    %c0_12 = arith.constant 0 : index
    %21 = vector.load %arg3[%c0_11, %c0_12] : memref<8x16xf32, #tpu.memory_space<vmem>>, vector<8x16xf32>
    %c0_13 = arith.constant 0 : index
    %c0_14 = arith.constant 0 : index
    %22 = vector.load %arg4[%c0_13, %c0_14] : memref<8x16xf32, #tpu.memory_space<vmem>>, vector<8x16xf32>
    %c0_15 = arith.constant 0 : index
    %c0_16 = arith.constant 0 : index
    %23 = vector.load %arg2[%c0_15, %c0_16] : memref<8x8xf32, #tpu.memory_space<vmem>>, vector<8x8xf32>
    %24 = vector.extract_strided_slice %20 {offsets = [0, 0], sizes = [8, 16], strides = [1, 1]} : vector<8x96xf32> to vector<8x16xf32>
    %25 = vector.extract_strided_slice %20 {offsets = [0, 16], sizes = [8, 16], strides = [1, 1]} : vector<8x96xf32> to vector<8x16xf32>
    %26 = vector.extract_strided_slice %20 {offsets = [0, 32], sizes = [8, 16], strides = [1, 1]} : vector<8x96xf32> to vector<8x16xf32>
    %27 = vector.extract_strided_slice %20 {offsets = [0, 48], sizes = [8, 16], strides = [1, 1]} : vector<8x96xf32> to vector<8x16xf32>
    %28 = arith.mulf %24, %21 : vector<8x16xf32>
    %29 = arith.mulf %25, %22 : vector<8x16xf32>
    %30 = arith.subf %28, %29 : vector<8x16xf32>
    %31 = arith.truncf %30 : vector<8x16xf32> to vector<8x16xbf16>
    %32 = arith.mulf %24, %22 : vector<8x16xf32>
    %33 = arith.mulf %25, %21 : vector<8x16xf32>
    %34 = arith.addf %32, %33 : vector<8x16xf32>
    %35 = arith.truncf %34 : vector<8x16xf32> to vector<8x16xbf16>
    %36 = arith.mulf %26, %21 : vector<8x16xf32>
    %37 = arith.mulf %27, %22 : vector<8x16xf32>
    %38 = arith.subf %36, %37 : vector<8x16xf32>
    %39 = arith.truncf %38 : vector<8x16xf32> to vector<8x16xbf16>
    %40 = arith.mulf %26, %22 : vector<8x16xf32>
    %41 = arith.mulf %27, %21 : vector<8x16xf32>
    %42 = arith.addf %40, %41 : vector<8x16xf32>
    %43 = arith.truncf %42 : vector<8x16xf32> to vector<8x16xbf16>
    %44 = vector.extract_strided_slice %20 {offsets = [0, 64], sizes = [8, 32], strides = [1, 1]} : vector<8x96xf32> to vector<8x32xf32>
    %45 = arith.truncf %44 : vector<8x32xf32> to vector<8x32xbf16>
    %46 = vector.extract_strided_slice %31 {offsets = [0, 0], sizes = [8, 4], strides = [1, 1]} : vector<8x16xbf16> to vector<8x4xbf16>
    %47 = vector.extract_strided_slice %39 {offsets = [0, 0], sizes = [8, 4], strides = [1, 1]} : vector<8x16xbf16> to vector<8x4xbf16>
    %cst_17 = arith.constant dense<0.000000e+00> : vector<8x8xf32>
    %48 = tpu.matmul %46, %47, %cst_17 {dimension_numbers = #tpu.dot_dimension_numbers<[1], [1], [0], [0], [0, 0, 1, 0], [], []>} : vector<8x4xbf16>, vector<8x4xbf16>, vector<8x8xf32> -> vector<8x8xf32>
    %49 = vector.extract_strided_slice %35 {offsets = [0, 0], sizes = [8, 4], strides = [1, 1]} : vector<8x16xbf16> to vector<8x4xbf16>
    %50 = vector.extract_strided_slice %43 {offsets = [0, 0], sizes = [8, 4], strides = [1, 1]} : vector<8x16xbf16> to vector<8x4xbf16>
    %cst_18 = arith.constant dense<0.000000e+00> : vector<8x8xf32>
    %51 = tpu.matmul %49, %50, %cst_18 {dimension_numbers = #tpu.dot_dimension_numbers<[1], [1], [0], [0], [0, 0, 1, 0], [], []>} : vector<8x4xbf16>, vector<8x4xbf16>, vector<8x8xf32> -> vector<8x8xf32>
    %52 = arith.addf %48, %51 : vector<8x8xf32>
    %53 = arith.addf %52, %23 : vector<8x8xf32>
    %cst_19 = arith.constant dense<0xFF800000> : vector<8xf32>
    %54 = vector.multi_reduction <maximumf>, %53, %cst_19 [1] : vector<8x8xf32> to vector<8xf32>
    %55 = vector.shape_cast %54 : vector<8xf32> to vector<8x1xf32>
    %56 = vector.broadcast %55 : vector<8x1xf32> to vector<8x8xf32>
    %57 = arith.subf %53, %56 : vector<8x8xf32>
    %58 = math.exp %57 : vector<8x8xf32>
    %cst_20 = arith.constant dense<0.000000e+00> : vector<8xf32>
    %59 = vector.multi_reduction <add>, %58, %cst_20 [1] : vector<8x8xf32> to vector<8xf32>
    %60 = vector.shape_cast %59 : vector<8xf32> to vector<8x1xf32>
    %61 = arith.truncf %58 : vector<8x8xf32> to vector<8x8xbf16>
    %62 = vector.extract_strided_slice %45 {offsets = [0, 0], sizes = [8, 8], strides = [1, 1]} : vector<8x32xbf16> to vector<8x8xbf16>
    %cst_21 = arith.constant dense<0.000000e+00> : vector<8x8xf32>
    %63 = tpu.matmul %61, %62, %cst_21 {dimension_numbers = #tpu.dot_dimension_numbers<[1], [0], [0], [1], [0, 0, 1, 1], [], []>} : vector<8x8xbf16>, vector<8x8xbf16>, vector<8x8xf32> -> vector<8x8xf32>
    %64 = tpu.reciprocal %60 : vector<8x1xf32> -> vector<8x1xf32>
    %65 = vector.broadcast %64 : vector<8x1xf32> to vector<8x8xf32>
    %66 = arith.mulf %63, %65 : vector<8x8xf32>
    %67 = arith.truncf %66 : vector<8x8xf32> to vector<8x8xbf16>
    %c0_22 = arith.constant 0 : index
    %c0_23 = arith.constant 0 : index
    %68 = vector.load %arg16[%c0_22, %c0_23] : memref<8x32xbf16, #tpu.memory_space<vmem>>, vector<8x8xbf16>
    tpu.vector_store %arg16[%c0_22, %c0_23], %67 {strides = array<i32>} : memref<8x32xbf16, #tpu.memory_space<vmem>>, vector<8x8xbf16>,
    %69 = vector.extract_strided_slice %31 {offsets = [0, 4], sizes = [8, 4], strides = [1, 1]} : vector<8x16xbf16> to vector<8x4xbf16>
    %70 = vector.extract_strided_slice %39 {offsets = [0, 4], sizes = [8, 4], strides = [1, 1]} : vector<8x16xbf16> to vector<8x4xbf16>
    %cst_24 = arith.constant dense<0.000000e+00> : vector<8x8xf32>
    %71 = tpu.matmul %69, %70, %cst_24 {dimension_numbers = #tpu.dot_dimension_numbers<[1], [1], [0], [0], [0, 0, 1, 0], [], []>} : vector<8x4xbf16>, vector<8x4xbf16>, vector<8x8xf32> -> vector<8x8xf32>
    %72 = vector.extract_strided_slice %35 {offsets = [0, 4], sizes = [8, 4], strides = [1, 1]} : vector<8x16xbf16> to vector<8x4xbf16>
    %73 = vector.extract_strided_slice %43 {offsets = [0, 4], sizes = [8, 4], strides = [1, 1]} : vector<8x16xbf16> to vector<8x4xbf16>
    %cst_25 = arith.constant dense<0.000000e+00> : vector<8x8xf32>
    %74 = tpu.matmul %72, %73, %cst_25 {dimension_numbers = #tpu.dot_dimension_numbers<[1], [1], [0], [0], [0, 0, 1, 0], [], []>} : vector<8x4xbf16>, vector<8x4xbf16>, vector<8x8xf32> -> vector<8x8xf32>
    %75 = arith.addf %71, %74 : vector<8x8xf32>
    %76 = arith.addf %75, %23 : vector<8x8xf32>
    %cst_26 = arith.constant dense<0xFF800000> : vector<8xf32>
    %77 = vector.multi_reduction <maximumf>, %76, %cst_26 [1] : vector<8x8xf32> to vector<8xf32>
    %78 = vector.shape_cast %77 : vector<8xf32> to vector<8x1xf32>
    %79 = vector.broadcast %78 : vector<8x1xf32> to vector<8x8xf32>
    %80 = arith.subf %76, %79 : vector<8x8xf32>
    %81 = math.exp %80 : vector<8x8xf32>
    %cst_27 = arith.constant dense<0.000000e+00> : vector<8xf32>
    %82 = vector.multi_reduction <add>, %81, %cst_27 [1] : vector<8x8xf32> to vector<8xf32>
    %83 = vector.shape_cast %82 : vector<8xf32> to vector<8x1xf32>
    %84 = arith.truncf %81 : vector<8x8xf32> to vector<8x8xbf16>
    %85 = vector.extract_strided_slice %45 {offsets = [0, 8], sizes = [8, 8], strides = [1, 1]} : vector<8x32xbf16> to vector<8x8xbf16>
    %cst_28 = arith.constant dense<0.000000e+00> : vector<8x8xf32>
    %86 = tpu.matmul %84, %85, %cst_28 {dimension_numbers = #tpu.dot_dimension_numbers<[1], [0], [0], [1], [0, 0, 1, 1], [], []>} : vector<8x8xbf16>, vector<8x8xbf16>, vector<8x8xf32> -> vector<8x8xf32>
    %87 = tpu.reciprocal %83 : vector<8x1xf32> -> vector<8x1xf32>
    %88 = vector.broadcast %87 : vector<8x1xf32> to vector<8x8xf32>
    %89 = arith.mulf %86, %88 : vector<8x8xf32>
    %90 = arith.truncf %89 : vector<8x8xf32> to vector<8x8xbf16>
    %c0_29 = arith.constant 0 : index
    %c8 = arith.constant 8 : index
    %91 = vector.load %arg16[%c0_29, %c8] : memref<8x32xbf16, #tpu.memory_space<vmem>>, vector<8x8xbf16>
    tpu.vector_store %arg16[%c0_29, %c8], %90 {strides = array<i32>} : memref<8x32xbf16, #tpu.memory_space<vmem>>, vector<8x8xbf16>,
    %92 = vector.extract_strided_slice %31 {offsets = [0, 8], sizes = [8, 4], strides = [1, 1]} : vector<8x16xbf16> to vector<8x4xbf16>
    %93 = vector.extract_strided_slice %39 {offsets = [0, 8], sizes = [8, 4], strides = [1, 1]} : vector<8x16xbf16> to vector<8x4xbf16>
    %cst_30 = arith.constant dense<0.000000e+00> : vector<8x8xf32>
    %94 = tpu.matmul %92, %93, %cst_30 {dimension_numbers = #tpu.dot_dimension_numbers<[1], [1], [0], [0], [0, 0, 1, 0], [], []>} : vector<8x4xbf16>, vector<8x4xbf16>, vector<8x8xf32> -> vector<8x8xf32>
    %95 = vector.extract_strided_slice %35 {offsets = [0, 8], sizes = [8, 4], strides = [1, 1]} : vector<8x16xbf16> to vector<8x4xbf16>
    %96 = vector.extract_strided_slice %43 {offsets = [0, 8], sizes = [8, 4], strides = [1, 1]} : vector<8x16xbf16> to vector<8x4xbf16>
    %cst_31 = arith.constant dense<0.000000e+00> : vector<8x8xf32>
    %97 = tpu.matmul %95, %96, %cst_31 {dimension_numbers = #tpu.dot_dimension_numbers<[1], [1], [0], [0], [0, 0, 1, 0], [], []>} : vector<8x4xbf16>, vector<8x4xbf16>, vector<8x8xf32> -> vector<8x8xf32>
    %98 = arith.addf %94, %97 : vector<8x8xf32>
    %99 = arith.addf %98, %23 : vector<8x8xf32>
    %cst_32 = arith.constant dense<0xFF800000> : vector<8xf32>
    %100 = vector.multi_reduction <maximumf>, %99, %cst_32 [1] : vector<8x8xf32> to vector<8xf32>
    %101 = vector.shape_cast %100 : vector<8xf32> to vector<8x1xf32>
    %102 = vector.broadcast %101 : vector<8x1xf32> to vector<8x8xf32>
    %103 = arith.subf %99, %102 : vector<8x8xf32>
    %104 = math.exp %103 : vector<8x8xf32>
    %cst_33 = arith.constant dense<0.000000e+00> : vector<8xf32>
    %105 = vector.multi_reduction <add>, %104, %cst_33 [1] : vector<8x8xf32> to vector<8xf32>
    %106 = vector.shape_cast %105 : vector<8xf32> to vector<8x1xf32>
    %107 = arith.truncf %104 : vector<8x8xf32> to vector<8x8xbf16>
    %108 = vector.extract_strided_slice %45 {offsets = [0, 16], sizes = [8, 8], strides = [1, 1]} : vector<8x32xbf16> to vector<8x8xbf16>
    %cst_34 = arith.constant dense<0.000000e+00> : vector<8x8xf32>
    %109 = tpu.matmul %107, %108, %cst_34 {dimension_numbers = #tpu.dot_dimension_numbers<[1], [0], [0], [1], [0, 0, 1, 1], [], []>} : vector<8x8xbf16>, vector<8x8xbf16>, vector<8x8xf32> -> vector<8x8xf32>
    %110 = tpu.reciprocal %106 : vector<8x1xf32> -> vector<8x1xf32>
    %111 = vector.broadcast %110 : vector<8x1xf32> to vector<8x8xf32>
    %112 = arith.mulf %109, %111 : vector<8x8xf32>
    %113 = arith.truncf %112 : vector<8x8xf32> to vector<8x8xbf16>
    %c0_35 = arith.constant 0 : index
    %c16 = arith.constant 16 : index
    %114 = vector.load %arg16[%c0_35, %c16] : memref<8x32xbf16, #tpu.memory_space<vmem>>, vector<8x8xbf16>
    tpu.vector_store %arg16[%c0_35, %c16], %113 {strides = array<i32>} : memref<8x32xbf16, #tpu.memory_space<vmem>>, vector<8x8xbf16>,
    %115 = vector.extract_strided_slice %31 {offsets = [0, 12], sizes = [8, 4], strides = [1, 1]} : vector<8x16xbf16> to vector<8x4xbf16>
    %116 = vector.extract_strided_slice %39 {offsets = [0, 12], sizes = [8, 4], strides = [1, 1]} : vector<8x16xbf16> to vector<8x4xbf16>
    %cst_36 = arith.constant dense<0.000000e+00> : vector<8x8xf32>
    %117 = tpu.matmul %115, %116, %cst_36 {dimension_numbers = #tpu.dot_dimension_numbers<[1], [1], [0], [0], [0, 0, 1, 0], [], []>} : vector<8x4xbf16>, vector<8x4xbf16>, vector<8x8xf32> -> vector<8x8xf32>
    %118 = vector.extract_strided_slice %35 {offsets = [0, 12], sizes = [8, 4], strides = [1, 1]} : vector<8x16xbf16> to vector<8x4xbf16>
    %119 = vector.extract_strided_slice %43 {offsets = [0, 12], sizes = [8, 4], strides = [1, 1]} : vector<8x16xbf16> to vector<8x4xbf16>
    %cst_37 = arith.constant dense<0.000000e+00> : vector<8x8xf32>
    %120 = tpu.matmul %118, %119, %cst_37 {dimension_numbers = #tpu.dot_dimension_numbers<[1], [1], [0], [0], [0, 0, 1, 0], [], []>} : vector<8x4xbf16>, vector<8x4xbf16>, vector<8x8xf32> -> vector<8x8xf32>
    %121 = arith.addf %117, %120 : vector<8x8xf32>
    %122 = arith.addf %121, %23 : vector<8x8xf32>
    %cst_38 = arith.constant dense<0xFF800000> : vector<8xf32>
    %123 = vector.multi_reduction <maximumf>, %122, %cst_38 [1] : vector<8x8xf32> to vector<8xf32>
    %124 = vector.shape_cast %123 : vector<8xf32> to vector<8x1xf32>
    %125 = vector.broadcast %124 : vector<8x1xf32> to vector<8x8xf32>
    %126 = arith.subf %122, %125 : vector<8x8xf32>
    %127 = math.exp %126 : vector<8x8xf32>
    %cst_39 = arith.constant dense<0.000000e+00> : vector<8xf32>
    %128 = vector.multi_reduction <add>, %127, %cst_39 [1] : vector<8x8xf32> to vector<8xf32>
    %129 = vector.shape_cast %128 : vector<8xf32> to vector<8x1xf32>
    %130 = arith.truncf %127 : vector<8x8xf32> to vector<8x8xbf16>
    %131 = vector.extract_strided_slice %45 {offsets = [0, 24], sizes = [8, 8], strides = [1, 1]} : vector<8x32xbf16> to vector<8x8xbf16>
    %cst_40 = arith.constant dense<0.000000e+00> : vector<8x8xf32>
    %132 = tpu.matmul %130, %131, %cst_40 {dimension_numbers = #tpu.dot_dimension_numbers<[1], [0], [0], [1], [0, 0, 1, 1], [], []>} : vector<8x8xbf16>, vector<8x8xbf16>, vector<8x8xf32> -> vector<8x8xf32>
    %133 = tpu.reciprocal %129 : vector<8x1xf32> -> vector<8x1xf32>
    %134 = vector.broadcast %133 : vector<8x1xf32> to vector<8x8xf32>
    %135 = arith.mulf %132, %134 : vector<8x8xf32>
    %136 = arith.truncf %135 : vector<8x8xf32> to vector<8x8xbf16>
    %c0_41 = arith.constant 0 : index
    %c24 = arith.constant 24 : index
    %137 = vector.load %arg16[%c0_41, %c24] : memref<8x32xbf16, #tpu.memory_space<vmem>>, vector<8x8xbf16>
    tpu.vector_store %arg16[%c0_41, %c24], %136 {strides = array<i32>} : memref<8x32xbf16, #tpu.memory_space<vmem>>, vector<8x8xbf16>,
    %c0_42 = arith.constant 0 : index
    %c0_43 = arith.constant 0 : index
    %138 = vector.load %arg16[%c0_42, %c0_43] : memref<8x32xbf16, #tpu.memory_space<vmem>>, vector<8x32xbf16>
    %c0_44 = arith.constant 0 : index
    %c0_45 = arith.constant 0 : index
    %139 = vector.load %arg9[%c0_44, %c0_45] : memref<32x32xbf16, #tpu.memory_space<vmem>>, vector<32x32xbf16>
    %cst_46 = arith.constant dense<0.000000e+00> : vector<8x32xf32>
    %140 = tpu.matmul %138, %139, %cst_46 {dimension_numbers = #tpu.dot_dimension_numbers<[1], [0], [0], [1], [0, 0, 1, 1], [], []>} : vector<8x32xbf16>, vector<32x32xbf16>, vector<8x32xf32> -> vector<8x32xf32>
    %c0_47 = arith.constant 0 : index
    %c0_48 = arith.constant 0 : index
    %141 = vector.load %arg10[%c0_47, %c0_48] : memref<1x32xf32, #tpu.memory_space<vmem>>, vector<1x32xf32>
    %142 = vector.broadcast %141 : vector<1x32xf32> to vector<8x32xf32>
    %143 = arith.addf %140, %142 : vector<8x32xf32>
    %144 = arith.addf %143, %14 : vector<8x32xf32>
    %c0_49 = arith.constant 0 : index
    %c0_50 = arith.constant 0 : index
    %145 = vector.load %arg6[%c0_49, %c0_50] : memref<1x32xf32, #tpu.memory_space<vmem>>, vector<1x32xf32>
    %146 = arith.mulf %144, %144 : vector<8x32xf32>
    %cst_51 = arith.constant dense<0.000000e+00> : vector<8xf32>
    %147 = vector.multi_reduction <add>, %146, %cst_51 [1] : vector<8x32xf32> to vector<8xf32>
    %148 = vector.shape_cast %147 : vector<8xf32> to vector<8x1xf32>
    %cst_52 = arith.constant 3.200000e+01 : f32
    %149 = vector.broadcast %cst_52 : f32 to vector<8x1xf32>
    %150 = arith.divf %148, %149 : vector<8x1xf32>
    %cst_53 = arith.constant 1.1920929E-7 : f32
    %151 = vector.broadcast %cst_53 : f32 to vector<8x1xf32>
    %152 = arith.addf %150, %151 : vector<8x1xf32>
    %153 = math.rsqrt %152 : vector<8x1xf32>
    %154 = vector.broadcast %153 : vector<8x1xf32> to vector<8x32xf32>
    %155 = arith.mulf %144, %154 : vector<8x32xf32>
    %156 = vector.broadcast %145 : vector<1x32xf32> to vector<8x32xf32>
    %157 = arith.mulf %155, %156 : vector<8x32xf32>
    %158 = arith.truncf %157 : vector<8x32xf32> to vector<8x32xbf16>
    %c0_54 = arith.constant 0 : index
    %c0_55 = arith.constant 0 : index
    %159 = vector.load %arg11[%c0_54, %c0_55] : memref<32x64xbf16, #tpu.memory_space<vmem>>, vector<32x64xbf16>
    %cst_56 = arith.constant dense<0.000000e+00> : vector<8x64xf32>
    %160 = tpu.matmul %158, %159, %cst_56 {dimension_numbers = #tpu.dot_dimension_numbers<[1], [0], [0], [1], [0, 0, 1, 1], [], []>} : vector<8x32xbf16>, vector<32x64xbf16>, vector<8x64xf32> -> vector<8x64xf32>
    %c0_57 = arith.constant 0 : index
    %c0_58 = arith.constant 0 : index
    %161 = vector.load %arg12[%c0_57, %c0_58] : memref<1x64xf32, #tpu.memory_space<vmem>>, vector<1x64xf32>
    %162 = vector.broadcast %161 : vector<1x64xf32> to vector<8x64xf32>
    %163 = arith.addf %160, %162 : vector<8x64xf32>
    %164 = arith.negf %163 : vector<8x64xf32>
    %165 = math.exp %164 : vector<8x64xf32>
    %cst_59 = arith.constant 1.000000e+00 : f32
    %166 = vector.broadcast %cst_59 : f32 to vector<8x64xf32>
    %167 = arith.addf %166, %165 : vector<8x64xf32>
    %168 = arith.divf %166, %167 : vector<8x64xf32>
    %169 = arith.mulf %163, %168 : vector<8x64xf32>
    %170 = arith.truncf %169 : vector<8x64xf32> to vector<8x64xbf16>
    %c0_60 = arith.constant 0 : index
    %c0_61 = arith.constant 0 : index
    %171 = vector.load %arg13[%c0_60, %c0_61] : memref<64x32xbf16, #tpu.memory_space<vmem>>, vector<64x32xbf16>
    %cst_62 = arith.constant dense<0.000000e+00> : vector<8x32xf32>
    %172 = tpu.matmul %170, %171, %cst_62 {dimension_numbers = #tpu.dot_dimension_numbers<[1], [0], [0], [1], [0, 0, 1, 1], [], []>} : vector<8x64xbf16>, vector<64x32xbf16>, vector<8x32xf32> -> vector<8x32xf32>
    %c0_63 = arith.constant 0 : index
    %c0_64 = arith.constant 0 : index
    %173 = vector.load %arg14[%c0_63, %c0_64] : memref<1x32xf32, #tpu.memory_space<vmem>>, vector<1x32xf32>
    %174 = vector.broadcast %173 : vector<1x32xf32> to vector<8x32xf32>
    %175 = arith.addf %172, %174 : vector<8x32xf32>
    %c0_65 = arith.constant 0 : index
    %c0_66 = arith.constant 0 : index
    %c0_67 = arith.constant 0 : index
    %176 = vector.load %arg15[%c0_65, %c0_66, %c0_67] : memref<1x8x32xf32, #tpu.memory_space<vmem>>, vector<1x8x32xf32>
    %177 = vector.shape_cast %176 : vector<1x8x32xf32> to vector<8x32xf32>
    %178 = vector.shape_cast %175 : vector<8x32xf32> to vector<1x8x32xf32>
    tpu.vector_store %arg15[%c0_65, %c0_66, %c0_67], %178 {strides = array<i32>} : memref<1x8x32xf32, #tpu.memory_space<vmem>>, vector<1x8x32xf32>,
    return
  }
  func.func @transform_0(%arg0: i32) -> (i32, i32, i32) {
    %c0_i32 = arith.constant 0 : i32
    %c0_i32_0 = arith.constant 0 : i32
    %c0_i32_1 = arith.constant 0 : i32
    return %arg0, %c0_i32, %c0_i32_0 : i32, i32, i32
  }
  func.func @transform_1(%arg0: i32) -> (i32, i32) {
    %c0_i32 = arith.constant 0 : i32
    %c0_i32_0 = arith.constant 0 : i32
    %c0_i32_1 = arith.constant 0 : i32
    return %c0_i32, %c0_i32_0 : i32, i32
  }
  func.func @transform_2(%arg0: i32) -> (i32, i32) {
    %c0_i32 = arith.constant 0 : i32
    %c0_i32_0 = arith.constant 0 : i32
    %c0_i32_1 = arith.constant 0 : i32
    return %c0_i32, %c0_i32_0 : i32, i32
  }
  func.func @transform_3(%arg0: i32) -> (i32, i32) {
    %c0_i32 = arith.constant 0 : i32
    %c0_i32_0 = arith.constant 0 : i32
    %c0_i32_1 = arith.constant 0 : i32
    return %c0_i32, %c0_i32_0 : i32, i32
  }
  func.func @transform_4(%arg0: i32) -> (i32, i32) {
    %c0_i32 = arith.constant 0 : i32
    %c0_i32_0 = arith.constant 0 : i32
    %c0_i32_1 = arith.constant 0 : i32
    return %c0_i32, %c0_i32_0 : i32, i32
  }
  func.func @transform_5(%arg0: i32) -> (i32, i32) {
    %c0_i32 = arith.constant 0 : i32
    %c0_i32_0 = arith.constant 0 : i32
    %c0_i32_1 = arith.constant 0 : i32
    return %c0_i32, %c0_i32_0 : i32, i32
  }
  func.func @transform_6(%arg0: i32) -> (i32, i32) {
    %c0_i32 = arith.constant 0 : i32
    %c0_i32_0 = arith.constant 0 : i32
    %c0_i32_1 = arith.constant 0 : i32
    return %c0_i32, %c0_i32_0 : i32, i32
  }
  func.func @transform_7(%arg0: i32) -> (i32, i32) {
    %c0_i32 = arith.constant 0 : i32
    %c0_i32_0 = arith.constant 0 : i32
    %c0_i32_1 = arith.constant 0 : i32
    return %c0_i32, %c0_i32_0 : i32, i32
  }
  func.func @transform_8(%arg0: i32) -> (i32, i32) {
    %c0_i32 = arith.constant 0 : i32
    %c0_i32_0 = arith.constant 0 : i32
    %c0_i32_1 = arith.constant 0 : i32
    return %c0_i32, %c0_i32_0 : i32, i32
  }
  func.func @transform_9(%arg0: i32) -> (i32, i32) {
    %c0_i32 = arith.constant 0 : i32
    %c0_i32_0 = arith.constant 0 : i32
    %c0_i32_1 = arith.constant 0 : i32
    return %c0_i32, %c0_i32_0 : i32, i32
  }
  func.func @transform_10(%arg0: i32) -> (i32, i32) {
    %c0_i32 = arith.constant 0 : i32
    %c0_i32_0 = arith.constant 0 : i32
    %c0_i32_1 = arith.constant 0 : i32
    return %c0_i32, %c0_i32_0 : i32, i32
  }
  func.func @transform_11(%arg0: i32) -> (i32, i32) {
    %c0_i32 = arith.constant 0 : i32
    %c0_i32_0 = arith.constant 0 : i32
    %c0_i32_1 = arith.constant 0 : i32
    return %c0_i32, %c0_i32_0 : i32, i32
  }
  func.func @transform_12(%arg0: i32) -> (i32, i32) {
    %c0_i32 = arith.constant 0 : i32
    %c0_i32_0 = arith.constant 0 : i32
    %c0_i32_1 = arith.constant 0 : i32
    return %c0_i32, %c0_i32_0 : i32, i32
  }
  func.func @transform_13(%arg0: i32) -> (i32, i32) {
    %c0_i32 = arith.constant 0 : i32
    %c0_i32_0 = arith.constant 0 : i32
    %c0_i32_1 = arith.constant 0 : i32
    return %c0_i32, %c0_i32_0 : i32, i32
  }
  func.func @transform_14(%arg0: i32) -> (i32, i32, i32) {
    %c0_i32 = arith.constant 0 : i32
    %c0_i32_0 = arith.constant 0 : i32
    %c0_i32_1 = arith.constant 0 : i32
    return %arg0, %c0_i32, %c0_i32_0 : i32, i32, i32
  }
}

</mosaic_0001>

<bundles_post_ra>
// kernel: tpu_custom_call.1
= control target key start
LH: loop header
LB: loop body
LE: loop exit
PB: predicated region body
PF: predicated region fallthrough
CT: control target
= control target key end

     0   :  { %s2140_s0 = inlined_call_operand.vmem [shape: f32[2,8,32], index: 0, kind: input, shape index: {}]   ;;  %s2141_s1 = inlined_call_operand.hbm [shape: f32[8,8], index: 1, kind: input, shape index: {}]   ;;  %s2142_s2 = inlined_call_operand.hbm [shape: f32[8,16], index: 2, kind: input, shape index: {}]   ;;  %s2143_s3 = inlined_call_operand.hbm [shape: f32[8,16], index: 3, kind: input, shape index: {}]   ;;  %s2144_s4 = inlined_call_operand.vmem [shape: f32[1,32], index: 4, kind: input, shape index: {}]   ;;  %s2145_s5 = inlined_call_operand.vmem [shape: f32[1,32], index: 5, kind: input, shape index: {}]   ;;  %s2146_s6 = inlined_call_operand.vmem [shape: bf16[32,96], index: 6, kind: input, shape index: {}]   ;;  %s2147_s7 = inlined_call_operand.vmem [shape: f32[1,96], index: 7, kind: input, shape index: {}]   ;;  %s2148_s8 = inlined_call_operand.vmem [shape: bf16[32,32], index: 8, kind: input, shape index: {}]   ;;  %s2149_s9 = inlined_call_operand.vmem [shape: f32[1,32], index: 9, kind: input, shape index: {}]   ;;  %s2150_s10 = inlined_call_operand.hbm [shape: bf16[32,64], index: 10, kind: input, shape index: {}]   ;;  %s2151_s11 = inlined_call_operand.vmem [shape: f32[1,64], index: 11, kind: input, shape index: {}]   ;;  %s2152_s12 = inlined_call_operand.vmem [shape: bf16[64,32], index: 12, kind: input, shape index: {}]   ;;  %s2153_s13 = inlined_call_operand.vmem [shape: f32[1,32], index: 13, kind: input, shape index: {}]   ;;  %s2154_s14 = inlined_call_operand.hbm [shape: f32[2,8,32], index: 14, kind: output, shape index: {}]  }
   0x1   :  { %2161 = sst [smem:[#allocation22_spill]] %s2141_s1 }
   0x2   :  { %2162 = sst [smem:[#allocation23_spill]] %s2142_s2 }
   0x3   :  { %2163 = sst [smem:[#allocation24_spill]] %s2143_s3 }
   0x4   :  { %19 = vsyncpa [#allocation4], 0 }
   0x5   :  { %20 = vsyncpa [#allocation7], 0 }
   0x6   :  { %21 = vsyncpa [#allocation10], 0 }
   0x7   :  { %22 = vsyncpa [#allocation5], 0 }
   0x8   :  { %24 = vsyncpa [#allocation5 + $0x1], 0  ;;  %s1857_s29 = smov 0   ;;  %s1859_s30 = smov 0  }
   0x9   :  { %s1861_s15 = smov 0   ;;  %s1863_s16 = smov 0  }
   0xa LB: > { %2164 = sst [smem:[#allocation16_spill]] %s1745_s29  ;;  %s1878_s17 = sadd.s32 4294967295, %s1757_s16   ;;  %s1757_s16 = sphi %s1863_s16, %s2180_s16   ;;  %s1753_s15 = sphi %s1861_s15, %s2182_s15   ;;  %s1749_s30 = sphi %s1859_s30, %s2184_s30   ;;  %s1745_s29 = sphi %s1857_s29, %s2183_s29  }
   0xb   : > { %2165 = sst [smem:[#allocation17_spill]] %s1753_s15  ;;  %s1347_s18 = sadd.s32 4294967294, %s1757_s16  }
   0xc   : > { %2166 = sst [smem:[#allocation18_spill]] %s1757_s16  ;;  %s1882_s19 = sadd.s32 1, %s1757_s16  }
   0xd   : > { %2167 = sst [smem:[#allocation19_spill]] %s1882_s19  ;;  %s336_s20 = sadd.s32 1, %s1753_s15 }
   0xe   : > { %s333_s21 = ssub.s32 %s1757_s16, %s1882_s19  ;;  %p346_p0 = scmp.ne.s32.totalorder %s1753_s15, %s1749_s30 }
   0xf   : > { %p334_p1 = scmp.eq.s32.totalorder %s333_s21, 0  ;;  %p347_p2 = scmp.eq.s32.totalorder %s1878_s17, 1 }
  0x10   : > { %p352_p3 = scmp.ne.s32.totalorder %s1749_s30, %s1745_s29  ;;  %p353_p4 = scmp.eq.s32.totalorder %s1347_s18, 1 }
  0x11   : > { %s1893_s22 = scalar_select %p334_p1, %s1753_s15, %s336_s20  }
  0x12   : > { %p1895_p5 = por %p347_p2, %p346_p0  ;;  %p1899_p6 = por %p353_p4, %p352_p3 }
  0x13   : > { %2168 = sst [smem:[#allocation20_spill]] %s1893_s22  ;;  %p1348_p7 = scmp.ge.s32.totalorder %s1757_s16, 1 }
  0x14   : > { %s2170_s24 = scalar_select %p1899_p6, 1, 0 }
  0x15   : > { %p360_p8 = scmp.lt.s32.totalorder %s1757_s16, 3  ;;  %p1467_p9 = scmp.eq.s32.totalorder %s1878_s17, 0 }
  0x16   : > { %2171 = sst [smem:[#allocation21_spill]] %s2170_s24  ;;  %s1759_s18 = smov [#allocation6]  }
  0x17   : > { %p1906_p10 = pnand %p1348_p7, %p360_p8  ;;  %s2173_s2 = sld [smem:[#allocation23_spill]] }
  0x18   : > { %s386_s20 = sshll.u32 %s1759_s18, 4  ;;  %s2174_s1 = sld [smem:[#allocation22_spill]]  ;;  %s387_s20 = int_to_ptr.vmem [resolvable:$true] %s386_s20 }
  0x19   : > { %p1450_p11 = pneg %p1906_p10  ;;  %s2176_s3 = sld [smem:[#allocation24_spill]] }
  0x1a   : > { %s1760_s24 = smov [#allocation3]   ;;  %s1761_s29 = smov [#allocation8]  }
  0x1b   : > { %p1920_p12 = pnand %p1467_p9, %p1450_p11  ;;  %s374_s18 = sshll.u32 %s1760_s24, 4  ;;  %s375_s18 = int_to_ptr.vmem [resolvable:$true] %s374_s18 }
  0x1c   : > { %s398_s16 = sshll.u32 %s1761_s29, 4  ;;  %s1762_s26 = smov [#allocation9]   ;;  %s399_s16 = int_to_ptr.vmem [resolvable:$true] %s398_s16 }
  0x1d   : > { %s384_s28 = sshll.u32 %s2173_s2, 4  ;;  %s427_s27 = sshll.u32 %s1762_s26, 4  ;;  %s385_s28 = int_to_ptr.hbm [resolvable:$true] %s384_s28  ;;  %s428_s27 = int_to_ptr.vmem [resolvable:$true] %s427_s27 }
  0x1e   : > { %s372_s15 = sshll.u32 %s2174_s1, 4  ;;  %s425_s1 = sshll.u32 %s2150_s10, 4  ;;  %s373_s15 = int_to_ptr.hbm [resolvable:$true] %s372_s15  ;;  %s426_s1 = int_to_ptr.hbm [resolvable:$true] %s425_s1 }
  0x1f   : > { %s396_s2 = sshll.u32 %s2176_s3, 4  ;;  %s1763_s24 = smov 64   ;;  %s397_s2 = int_to_ptr.hbm [resolvable:$true] %s396_s2 }
  0x20   : > { %1456 = dma.hbm_to_vmem [thread:$0]  (!%p1920_p12), %s385_s28, 128, %s387_s20, [#allocation7]  }
  0x21   : > { %1453 = dma.hbm_to_vmem [thread:$0]  (!%p1920_p12), %s373_s15, 128, %s375_s18, [#allocation4]  }
  0x22   : > { %1459 = dma.hbm_to_vmem [thread:$0]  (!%p1920_p12), %s397_s2, 128, %s399_s16, [#allocation7]  }
  0x23   : > { %s1764_s3 = smov 4   ;;  %459 = sbr.rel (%p1906_p10) target bundleno = 2205 (0x89d), region = 76 }
  0x24   : > { %1462 = dma.hbm_to_vmem [thread:$0]  (!%p1920_p12), %s426_s1, 256, %s428_s27, [#allocation10], %s1763_s24, %s1763_s24, %s1764_s3  }
  0x28   : > { %1728 = dma.done.wait (%p1467_p9), [#allocation4], 128  }
  0x29   : > { %1730 = vsyncadd (%p1467_p9), [#allocation4], 4294967168 }
  0x2a   : > { %1732 = dma.done.wait (%p1467_p9), [#allocation7], 256  }
  0x2b   : > { %1734 = vsyncadd (%p1467_p9), [#allocation7], 4294967040 }
  0x2c   : > { %1736 = dma.done.wait (%p1467_p9), [#allocation10], 256  }
  0x2d   : > { %1738 = vsyncadd (%p1467_p9), [#allocation10], 4294967040  ;;  %p520_p13 = scmp.lt.s32.totalorder %s1878_s17, 1  ;;  %vm528_vm0 = vcmask 261120   ;;  %v1765_v3 = vmov 32.0   ;;  %v1423_v7 = vld [vmem:[%s2146_s6 + $0x8] sm:$0xff] }
  0x2e   : > { %1537 = vrcp.f32 %v1765_v3  ;;  %586 = vmatpush.bf16.msra.mxu0 %v1423_v7  ;;  %v1422_v9 = vld [vmem:[%s2146_s6] sm:$0xff]  ;;  %v1964_v11 = vld [vmem:[#allocation6] sm:$0xff]  ;;  %v1966_v12 = vld [vmem:[#allocation8] sm:$0xff]  ;;  %s1766_s20 = smov 48   ;;  %s1767_s18 = smov 32   ;;  %vm654_vm5 = vcmask 31744  }
  0x2f   : > { %s521_s1 = scalar_select %p520_p13, %s1878_s17, 1  ;;  %638 = vrot.lane.b32.xlu1 %v1964_v11, %s1766_s20  ;;  %v1531_v23 = vld [vmem:[%s2144_s4] ss:$0 sm:$0xff]  ;;  %vm718_vm6 = vcmask 1043456   ;;  %vm699_vm7 = vcmask 64512  }
  0x30   : > { %v1532_v28 = vld [vmem:[%s2147_s7] ss:$0 sm:$0xff]  ;;  %s1768_s24 = smov 112   ;;  %s1771_s3 = smov 64  }
  0x31   : > { %s1360_s2 = sshll.u32 %s521_s1, 3  ;;  %s1769_s1 = smov 16  }
  0x32   : > { %s523_s15 = scalar_lea.vmem %s2140_s0, %s1360_s2  ;;  %587 = vmatpush.bf16.msra.mxu0 %v1422_v9  ;;  %s1770_s2 = smov 96  }
  0x33   : > { %v525_v0 = vld [vmem:[%s523_s15] sm:$0xff]  ;;  %s1772_s29 = smov 92   ;;  %s1773_s15 = smov 124  }
  0x34   : > { %v527_v1 = vmul.f32 %v525_v0, %v525_v0  ;;  %v1538_v4 = vpop.eup %1537  ;;  %s1774_s16 = smov 88   ;;  %s1775_s19 = smov 120  }
  0x35   : > { %v533_v5 = vmul.f32 32.0, %v1538_v4  ;;  %vm537_vm1 = vweird.f32 %v1538_v4  ;;  %s1776_s25 = smov 84   ;;  %s1777_s28 = smov 116  }
  0x36   : > { %v529_v2 = vsel %vm528_vm0, %v527_v1, 0.0  ;;  %s1779_s22 = smov 40   ;;  %s1781_s27 = smov 24  }
  0x37   : > { %530 = vadd.xlane.f32.xlu0 %v529_v2  ;;  %v534_v6 = vsub.f32 1.0, %v533_v5  ;;  %620 = vrot.lane.b32.xlu1 %v1964_v11, %s1767_s18 }
  0x39   : > { %v535_v8 = vmul.f32 %v1538_v4, %v534_v6 }
  0x3b   : > { %v536_v10 = vadd.f32 %v1538_v4, %v535_v8 }
  0x3d   : > { %v1968_v13 = vsel %vm537_vm1, %v1538_v4, %v536_v10 }
  0x4b   : > { %624 = vrot.lane.b32.xlu0 %v1966_v12, %s1766_s20 }
  0xa1   : > { %v639_v32 = vpop.permute.xlu1 %638 }
  0xa9   : > { %v621_v36 = vpop.permute.xlu1 %620 }
  0xaa   : > { %v531_v14 = vpop.xlane.xlu0 %530 }
  0xab   : > { %v539_v15 = vmul.f32 %v1968_v13, %v531_v14 }
  0xad   : > { %v540_v16 = vadd.f32 1.1920929e-07, %v539_v15 }
  0xaf   : > { %1539 = vrsqrt.f32 %v540_v16  ;;  %vm547_vm3 = vweird.f32 %v540_v16 }
  0xb5   : > { %v1540_v17 = vpop.eup %1539 }
  0xb6   : > { %v542_v18 = vmul.f32 %v1540_v17, %v540_v16  ;;  %vm548_vm2 = vweird.f32 %v1540_v17 }
  0xb7   : > { %vm549_vm4 = vmor %vm547_vm3, %vm548_vm2 }
  0xb8   : > { %v543_v19 = vmul.f32 %v1540_v17, %v542_v18 }
  0xba   : > { %v544_v20 = vmul.f32 0.5, %v543_v19 }
  0xbc   : > { %v545_v21 = vsub.f32 1.5, %v544_v20 }
  0xbd   : > { %v625_v30 = vpop.permute.xlu0 %624 }
  0xbe   : > { %v546_v22 = vmul.f32 %v1540_v17, %v545_v21 }
  0xc0   : > { %v550_v24 = vsel %vm549_vm4, %v1540_v17, %v546_v22 }
  0xc1   : > { %v551_v25 = vmul.f32 %v550_v24, %v525_v0 }
  0xc3   : > { %v1980_v26 = vmul.f32 %v1531_v23, %v551_v25  ;;  %v2025_v25 = vld [vmem:[#allocation3] sm:$0xff] }
  0xc5   : > { %v556_v27 = vpack.c.bf16 %v1980_v26, %v1980_v26 }
  0xc7   : > { %1369 = vmatmul.msk.bf16.vlgmr.msra.gmra.mxu0 %vm528_vm0, %v556_v27 }
 0x144   : > { %v589_v29 = vpop.f32.mrf.mxu0 }
 0x145   : > { %v590_v31 = vadd.f32 %v1532_v28, %v589_v29 }
 0x147   : > { %v627_v33 = vmul.f32 %v625_v30, %v590_v31  ;;  %v641_v34 = vmul.f32 %v639_v32, %v590_v31  ;;  %v623_v37 = vmul.f32 %v621_v36, %v590_v31  ;;  %v648_v52 = vpack.c.bf16 %v590_v31, %v590_v31 }
 0x148   : > { %v608_v59 = vmul.f32 %v1966_v12, %v590_v31  ;;  %v596_v1 = vmul.f32 %v1964_v11, %v590_v31 }
 0x149   : > { %643 = vrot.lane.b32.xlu1 %v641_v34, %s1768_s24  ;;  %629 = vrot.lane.b32.xlu2 %v627_v33, %s1768_s24  ;;  %v711_v55 = vunpack.c.l.b16 %v648_v52 }
 0x14b   : > { %v2001_v56 = vpack.c.b16 %v711_v55, %v711_v55 }
 0x14c   : > { %v591_v35 = vpop.f32.mrf.mxu0 }
 0x151   : > { %610 = vrot.lane.b32.xlu1 %v1964_v11, %s1769_s1  ;;  %634 = vrot.lane.b32.xlu2 %v1966_v12, %s1767_s18  ;;  %s1778_s18 = smov 56  }
 0x159   : > { %598 = vrot.lane.b32.xlu2 %v1966_v12, %s1769_s1 }
 0x1a3   : > { %v630_v38 = vpop.permute.xlu2 %629 }
 0x1a4   : > { %v632_v39 = vsub.f32 %v623_v37, %v630_v38 }
 0x1a6   : > { %v633_v40 = vpack.c.bf16 %v632_v39, %v632_v39 }
 0x1a8   : > { %v675_v41 = vunpack.c.l.b16 %v633_v40 }
 0x1aa   : > { %v1996_v42 = vpack.c.b16 %v675_v41, %v675_v41 }
 0x1ab   : > { %v635_v43 = vpop.permute.xlu2 %634 }
 0x1ac   : > { %677 = vrot.lane.b32.xlu2 %v1996_v42, %s1770_s2  ;;  %v637_v46 = vmul.f32 %v635_v43, %v590_v31 }
 0x1b3   : > { %v599_v44 = vpop.permute.xlu2 %598 }
 0x1b4   : > { %v601_v45 = vmul.f32 %v599_v44, %v590_v31 }
 0x1b6   : > { %603 = vrot.lane.b32.xlu0 %v601_v45, %s1768_s24 }
 0x1bb   : > { %v644_v47 = vpop.permute.xlu1 %643 }
 0x1bc   : > { %v646_v48 = vadd.f32 %v644_v47, %v637_v46 }
 0x1be   : > { %v647_v49 = vpack.c.bf16 %v646_v48, %v646_v48 }
 0x1c0   : > { %v650_v50 = vunpack.c.l.b16 %v647_v49 }
 0x1c2   : > { %v651_v51 = vpack.c.b16 %v650_v50, %v650_v50 }
 0x1c3   : > { %v611_v53 = vpop.permute.xlu1 %610 }
 0x1c4   : > { %v613_v54 = vmul.f32 %v611_v53, %v590_v31  ;;  %652 = vrot.lane.b32.xlu1 %v651_v51, %s1770_s2 }
 0x1c6   : > { %615 = vrot.lane.b32.xlu2 %v613_v54, %s1768_s24  ;;  %s517_s24 = sand.u32 1, %s1749_s30  }
 0x1c7   : > { %s1359_s2 = sshll.u32 %s517_s24, 3 }
 0x1cc   : > { %713 = vrot.lane.b32.xlu1 %v2001_v56, %s1771_s3 }
 0x1ce   : > { %758 = vrot.lane.b32.xlu2 %v651_v51, %s1772_s29 }
 0x1d4   : > { %784 = vrot.lane.b32.xlu1 %v1996_v42, %s1772_s29 }
 0x206   : > { %v678_v57 = vpop.permute.xlu2 %677 }
 0x207   : > { %v683_v58 = vsel %vm654_vm5, %v678_v57, 0 }
 0x208   : > { %692 = vmatpush.bf16.xpose.msra.mxu2 %v683_v58 }
 0x220   : > { %v616_v60 = vpop.permute.xlu2 %615 }
 0x221   : > { %v618_v61 = vadd.f32 %v616_v60, %v608_v59 }
 0x223   : > { %v619_v62 = vpack.c.bf16 %v618_v61, %v618_v61 }
 0x225   : > { %v754_v63 = vunpack.c.l.b16 %v619_v62 }
 0x227   : > { %v755_v0 = vpack.c.b16 %v754_v63, %v754_v63 }
 0x228   : > { %v604_v2 = vpop.permute.xlu0 %603  ;;  %v759_v9 = vpop.permute.xlu2 %758 }
 0x229   : > { %v606_v3 = vsub.f32 %v596_v1, %v604_v2  ;;  %756 = vrot.lane.b32.xlu2 %v755_v0, %s1773_s15  ;;  %v764_v12 = vsel %vm654_vm5, %v759_v9, 0 }
 0x22b   : > { %v607_v4 = vpack.c.bf16 %v606_v3, %v606_v3 }
 0x22d   : > { %v780_v5 = vunpack.c.l.b16 %v607_v4  ;;  %1371 = vmatmul.msk.bf16.vlgmr.msra.gmra.mxu2 %vm654_vm5, %v607_v4 }
 0x22f   : > { %v2009_v6 = vpack.c.b16 %v780_v5, %v780_v5 }
 0x231   : > { %782 = vrot.lane.b32.xlu1 %v2009_v6, %s1773_s15 }
 0x236   : > { %v653_v7 = vpop.permute.xlu1 %652 }
 0x237   : > { %v659_v8 = vsel %vm654_vm5, %v653_v7, 0 }
 0x238   : > { %668 = vmatpush.bf16.xpose.msra.mxu1 %v659_v8 }
 0x239   : > { %861 = vrot.lane.b32.xlu1 %v651_v51, %s1774_s16 }
 0x23e   : > { %v714_v10 = vpop.permute.xlu1 %713 }
 0x23f   : > { %1370 = vmatmul.msk.bf16.vlgmr.msra.gmra.mxu1 %vm654_vm5, %v619_v62  ;;  %v720_v11 = vsel %vm718_vm6, %v714_v10, 0 }
 0x240   : > { %729 = vmatpush.bf16.msra.mxu3 %v720_v11 }
 0x241   : > { %859 = vrot.lane.b32.xlu1 %v755_v0, %s1775_s19 }
 0x244   : > { %773 = vmatpush.bf16.xpose.msrb.mxu3 %v764_v12 }
 0x246   : > { %v785_v14 = vpop.permute.xlu1 %784 }
 0x247   : > { %v790_v15 = vsel %vm654_vm5, %v785_v14, 0 }
 0x248   : > { %799 = vmatpush.bf16.xpose.msrb.mxu0 %v790_v15 }
 0x249   : > { %984 = vrot.lane.b32.xlu1 %v1996_v42, %s1776_s25 }
 0x251   : > { %884 = vrot.lane.b32.xlu1 %v1996_v42, %s1774_s16 }
 0x259   : > { %961 = vrot.lane.b32.xlu1 %v651_v51, %s1776_s25  ;;  %s519_s25 = scalar_lea.vmem [#allocation11], %s1359_s2 }
 0x261   : > { %959 = vrot.lane.b32.xlu1 %v755_v0, %s1777_s28 }
 0x283   : > { %v757_v46 = vpop.permute.xlu2 %756 }
 0x2a3   : > { %v783_v16 = vpop.permute.xlu1 %782 }
 0x2a4   : > { %1374 = vmatmul.msk.bf16.vlgmr.msrb.gmra.mxu0 %vm654_vm5, %v783_v16 }
 0x2ab   : > { %v862_v17 = vpop.permute.xlu1 %861 }
 0x2ac   : > { %v867_v18 = vsel %vm654_vm5, %v862_v17, 0 }
 0x2ad   : > { %876 = vmatpush.bf16.xpose.msrb.mxu2 %v867_v18 }
 0x2b0   : > { %v694_v19 = vpop.f32.mrf.mxu2 }
 0x2b3   : > { %v860_v20 = vpop.permute.xlu1 %859 }
 0x2b4   : > { %1376 = vmatmul.msk.bf16.vlgmr.msrb.gmra.mxu2 %vm654_vm5, %v860_v20 }
 0x2b8   : > { %v696_v21 = vpop.f32.mrf.mxu2 }
 0x2bb   : > { %v985_v22 = vpop.permute.xlu1 %984 }
 0x2bc   : > { %v990_v23 = vsel %vm654_vm5, %v985_v22, 0  ;;  %v670_v24 = vpop.f32.mrf.mxu1 }
 0x2bd   : > { %v695_v27 = vadd.f32 %v694_v19, %v670_v24  ;;  %999 = vmatpush.bf16.xpose.msra.mxu2 %v990_v23 }
 0x2bf   : > { %v698_v28 = vadd.f32 %v695_v27, %v2025_v25 }
 0x2c1   : > { %v700_v29 = vsel %vm699_vm7, %v698_v28, -inf }
 0x2c2   : > { %701 = vmax.xlane.f32.xlu0 %v700_v29 }
 0x2c3   : > { %v885_v37 = vpop.permute.xlu1 %884 }
 0x2c4   : > { %v672_v30 = vpop.f32.mrf.mxu1  ;;  %v890_v41 = vsel %vm654_vm5, %v885_v37, 0 }
 0x2cb   : > { %v962_v42 = vpop.permute.xlu1 %961 }
 0x2cc   : > { %v967_v45 = vsel %vm654_vm5, %v962_v42, 0 }
 0x2d3   : > { %v960_v0 = vpop.permute.xlu1 %959 }
 0x2d6   : > { %816 = vrot.lane.b32.xlu0 %v2001_v56, %s1778_s18 }
 0x2de   : > { %882 = vrot.lane.b32.xlu0 %v2009_v6, %s1775_s19 }
 0x321   : > { %v801_v31 = vpop.f32.mrf.mxu0 }
 0x329   : > { %v803_v32 = vpop.f32.mrf.mxu0 }
 0x335   : > { %v702_v33 = vpop.xlane.xlu0 %701 }
 0x336   : > { %v703_v34 = vsub.f32 %v698_v28, %v702_v33 }
 0x337   : > { %v878_v35 = vpop.f32.mrf.mxu2 }
 0x338   : > { %v704_v36 = vmul.f32 1.442695, %v703_v34 }
 0x33a   : > { %1541 = vpow2.f32 %v704_v36 }
 0x33f   : > { %v880_v38 = vpop.f32.mrf.mxu2 }
 0x340   : > { %v2032_v39 = vpop.eup %1541 }
 0x341   : > { %v709_v40 = vpack.c.bf16 %v2032_v39, %v2032_v39  ;;  %v706_v28 = vsel %vm699_vm7, %v2032_v39, 0.0 }
 0x343   : > { %1372 = vmatmul.msk.bf16.vlgmr.msra.gmra.mxu3 %vm699_vm7, %v709_v40 }
 0x344   : > { %899 = vmatpush.bf16.xpose.msra.mxu3 %v890_v41 }
 0x348   : > { %v817_v43 = vpop.permute.xlu0 %816 }
 0x349   : > { %v822_v44 = vsel %vm718_vm6, %v817_v43, 0 }
 0x34a   : > { %831 = vmatpush.bf16.msrb.mxu1 %v822_v44 }
 0x34e   : > { %976 = vmatpush.bf16.xpose.msra.mxu1 %v967_v45 }
 0x350   : > { %v883_v47 = vpop.permute.xlu0 %882 }
 0x353   : > { %1373 = vmatmul.msk.bf16.vlgmr.msrb.gmra.mxu3 %vm654_vm5, %v757_v46 }
 0x363   : > { %1377 = vmatmul.msk.bf16.vlgmr.msra.gmra.mxu3 %vm654_vm5, %v883_v47 }
 0x3c6   : > { %v2042_v48 = vpop.f32.mrf.mxu3 }
 0x3ce   : > { %v733_v49 = vpop.f32.mrf.mxu3 }
 0x3d6   : > { %v775_v50 = vpop.f32.mrf.mxu3 }
 0x3d7   : > { %v802_v51 = vadd.f32 %v801_v31, %v775_v50 }
 0x3d9   : > { %v805_v52 = vadd.f32 %v802_v51, %v2025_v25 }
 0x3db   : > { %v806_v53 = vsel %vm699_vm7, %v805_v52, -inf }
 0x3dc   : > { %807 = vmax.xlane.f32.xlu2 %v806_v53 }
 0x3de   : > { %v777_v54 = vpop.f32.mrf.mxu3 }
 0x3e6   : > { %v901_v55 = vpop.f32.mrf.mxu3 }
 0x3e7   : > { %v902_v57 = vadd.f32 %v901_v55, %v878_v35 }
 0x3e9   : > { %v905_v58 = vadd.f32 %v902_v57, %v2025_v25 }
 0x3eb   : > { %v906_v59 = vsel %vm699_vm7, %v905_v58, -inf }
 0x3ec   : > { %907 = vmax.xlane.f32.xlu1 %v906_v59 }
 0x3ee   : > { %v903_v60 = vpop.f32.mrf.mxu3 }
 0x3f4   : > { %982 = vrot.lane.b32.xlu2 %v2009_v6, %s1777_s28  ;;  %s1244_s28 = sshll.u32 %s519_s25, 4  ;;  %s1245_s28 = int_to_ptr.vmem [resolvable:$true] %s1244_s28 }
 0x3fc   : > { %1016 = vrot.lane.b32.xlu2 %v2001_v56, %s1779_s22 }
 0x404   : > { %916 = vrot.lane.b32.xlu2 %v2001_v56, %s1766_s20  ;;  %s1780_s20 = smov 8  }
 0x44f   : > { %v808_v61 = vpop.xlane.xlu2 %807 }
 0x450   : > { %v809_v62 = vsub.f32 %v805_v52, %v808_v61 }
 0x452   : > { %v810_v63 = vmul.f32 1.442695, %v809_v62 }
 0x454   : > { %1543 = vpow2.f32 %v810_v63 }
 0x457   : > { %v983_v1 = vpop.permute.xlu2 %982 }
 0x458   : > { %1380 = vmatmul.msk.bf16.vlgmr.msra.gmra.mxu2 %vm654_vm5, %v983_v1 }
 0x45a   : > { %v1544_v2 = vpop.eup %1543 }
 0x45b   : > { %v812_v3 = vsel %vm699_vm7, %v1544_v2, 0.0  ;;  %v815_v4 = vpack.c.bf16 %v1544_v2, %v1544_v2 }
 0x45c   : > { %813 = vadd.xlane.f32.xlu2 %v812_v3 }
 0x45d   : > { %1375 = vmatmul.msk.bf16.vlgmr.msrb.gmra.mxu1 %vm699_vm7, %v815_v4 }
 0x45f   : > { %v1017_v5 = vpop.permute.xlu2 %1016  ;;  %v908_v6 = vpop.xlane.xlu1 %907 }
 0x460   : > { %v1022_v7 = vsel %vm718_vm6, %v1017_v5, 0  ;;  %v909_v56 = vsub.f32 %v905_v58, %v908_v6 }
 0x461   : > { %1031 = vmatpush.bf16.msrb.mxu3 %v1022_v7 }
 0x462   : > { %v910_v8 = vmul.f32 1.442695, %v909_v56 }
 0x464   : > { %1545 = vpow2.f32 %v910_v8 }
 0x467   : > { %v917_v9 = vpop.permute.xlu2 %916 }
 0x468   : > { %v922_v10 = vsel %vm718_vm6, %v917_v9, 0 }
 0x469   : > { %931 = vmatpush.bf16.msra.mxu0 %v922_v10  ;;  %v1425_v10 = vld [vmem:[%s2148_s8 + $0x8] sm:$0xff] }
 0x46a   : > { %v1546_v11 = vpop.eup %1545 }
 0x46b   : > { %v915_v12 = vpack.c.bf16 %v1546_v11, %v1546_v11  ;;  %v912_v27 = vsel %vm699_vm7, %v1546_v11, 0.0 }
 0x46d   : > { %1378 = vmatmul.msk.bf16.vlgmr.msra.gmra.mxu0 %vm699_vm7, %v915_v12  ;;  %1379 = vmatmul.msk.bf16.vlgmr.msra.gmra.mxu1 %vm654_vm5, %v960_v0  ;;  %vm751_vm5 = vcmask 60416  }
 0x46e   : > { %1089 = vmatpush.bf16.msrb.mxu0 %v1425_v10 }
 0x4cf   : > { %v814_v29 = vpop.xlane.xlu2 %813 }
 0x4d0   : > { %1547 = vrcp.f32 %v814_v29  ;;  %v846_v51 = vand.u32 2147483647, %v814_v29  ;;  %v848_v52 = vand.u32 2147483648, %v814_v29  ;;  %vm842_vm12 = vweird.f32 %v814_v29 }
 0x4d2   : > { %vm847_vm15 = vcmp.eq.f32.partialorder %v846_v51, 8.507059e+37  ;;  %v849_v61 = vor.u32 1.1754944e-38, %v848_v52 }
 0x4d6   : > { %v1548_v33 = vpop.eup %1547 }
 0x4d7   : > { %v838_v34 = vmul.f32 %v1548_v33, %v814_v29  ;;  %vm843_vm9 = vweird.f32 %v1548_v33 }
 0x4d8   : > { %vm844_vm14 = vmor %vm842_vm12, %vm843_vm9  ;;  %vm1057_vm12 = vcmask 257216  }
 0x4d9   : > { %v839_v38 = vsub.f32 1.0, %v838_v34 }
 0x4da   : > { %v2060_v14 = vpop.f32.mrf.mxu1 }
 0x4db   : > { %v1001_v15 = vpop.f32.mrf.mxu2  ;;  %v840_v42 = vmul.f32 %v1548_v33, %v839_v38 }
 0x4dd   : > { %v841_v47 = vadd.f32 %v1548_v33, %v840_v42 }
 0x4df   : > { %v845_v58 = vsel %vm844_vm14, %v1548_v33, %v841_v47  ;;  %v1533_v33 = vld [vmem:[%s2149_s9] ss:$0 sm:$0xff] }
 0x4e0   : > { %v850_v2 = vsel %vm847_vm15, %v849_v61, %v845_v58  ;;  %v1535_v58 = vld [vmem:[%s2151_s11] ss:$0 sm:$0xff] }
 0x4e1   : > { %v851_v5 = vmul.f32 %v850_v2, %v2060_v14 }
 0x4e2   : > { %v835_v16 = vpop.f32.mrf.mxu1 }
 0x4e3   : > { %v1003_v17 = vpop.f32.mrf.mxu2  ;;  %v852_v8 = vpack.c.bf16 %v851_v5, %v851_v5 }
 0x4ea   : > { %v933_v18 = vpop.f32.mrf.mxu0  ;;  %v978_v19 = vpop.f32.mrf.mxu1 }
 0x4eb   : > { %v1002_v20 = vadd.f32 %v1001_v15, %v978_v19 }
 0x4ed   : > { %v1005_v21 = vadd.f32 %v1002_v20, %v2025_v25 }
 0x4ef   : > { %v1006_v22 = vsel %vm699_vm7, %v1005_v21, -inf }
 0x4f0   : > { %1007 = vmax.xlane.f32.xlu0 %v1006_v22 }
 0x4f2   : > { %v935_v23 = vpop.f32.mrf.mxu0  ;;  %v980_v24 = vpop.f32.mrf.mxu1 }
 0x4f8   : > { %913 = vadd.xlane.f32.xlu0 %v912_v27 }
 0x500   : > { %707 = vadd.xlane.f32.xlu0 %v706_v28 }
 0x563   : > { %v1008_v30 = vpop.xlane.xlu0 %1007 }
 0x564   : > { %v1009_v31 = vsub.f32 %v1005_v21, %v1008_v30  ;;  %v1424_v30 = vld [vmem:[%s2148_s8] sm:$0xff] }
 0x565   : > { %1090 = vmatpush.bf16.msrb.mxu0 %v1424_v30 }
 0x566   : > { %v1010_v32 = vmul.f32 1.442695, %v1009_v31 }
 0x568   : > { %1549 = vpow2.f32 %v1010_v32 }
 0x56b   : > { %v914_v25 = vpop.xlane.xlu0 %913 }
 0x56c   : > { %1551 = vrcp.f32 %v914_v25  ;;  %v948_v44 = vand.u32 2147483648, %v914_v25  ;;  %v946_v46 = vand.u32 2147483647, %v914_v25  ;;  %vm942_vm10 = vweird.f32 %v914_v25 }
 0x56e   : > { %v1550_v35 = vpop.eup %1549  ;;  %v949_v53 = vor.u32 1.1754944e-38, %v948_v44  ;;  %vm947_vm13 = vcmp.eq.f32.partialorder %v946_v46, 8.507059e+37 }
 0x56f   : > { %v1015_v36 = vpack.c.bf16 %v1550_v35, %v1550_v35  ;;  %v1012_v37 = vsel %vm699_vm7, %v1550_v35, 0.0 }
 0x570   : > { %1013 = vadd.xlane.f32.xlu1 %v1012_v37 }
 0x571   : > { %1381 = vmatmul.msk.bf16.vlgmr.msrb.gmra.mxu3 %vm699_vm7, %v1015_v36 }
 0x572   : > { %v1552_v39 = vpop.eup %1551 }
 0x573   : > { %v938_v40 = vmul.f32 %v1552_v39, %v914_v25  ;;  %v708_v41 = vpop.xlane.xlu0 %707  ;;  %vm943_vm8 = vweird.f32 %v1552_v39 }
 0x574   : > { %1553 = vrcp.f32 %v708_v41  ;;  %vm944_vm11 = vmor %vm942_vm10, %vm943_vm8  ;;  %v746_v62 = vand.u32 2147483648, %v708_v41  ;;  %v744_v0 = vand.u32 2147483647, %v708_v41  ;;  %vm740_vm2 = vweird.f32 %v708_v41 }
 0x575   : > { %v939_v43 = vsub.f32 1.0, %v938_v40  ;;  %vm857_vm10 = vcmask 126016   ;;  %v1426_v40 = vld [vmem:[#allocation9] sm:$0xff] }
 0x576   : > { %v747_v4 = vor.u32 1.1754944e-38, %v746_v62  ;;  %vm745_vm4 = vcmp.eq.f32.partialorder %v744_v0, 8.507059e+37 }
 0x577   : > { %v940_v45 = vmul.f32 %v1552_v39, %v939_v43 }
 0x579   : > { %v941_v49 = vadd.f32 %v1552_v39, %v940_v45 }
 0x57a   : > { %v1554_v50 = vpop.eup %1553 }
 0x57b   : > { %v736_v54 = vmul.f32 %v1554_v50, %v708_v41  ;;  %v945_v55 = vsel %vm944_vm11, %v1552_v39, %v941_v49  ;;  %vm741_vm1 = vweird.f32 %v1554_v50  ;;  %vm957_vm11 = vcmask 191616   ;;  %v1427_v39 = vld [vmem:[#allocation9 + $0x8] sm:$0xff] }
 0x57c   : > { %v950_v57 = vsel %vm947_vm13, %v949_v53, %v945_v55  ;;  %vm742_vm3 = vmor %vm740_vm2, %vm741_vm1  ;;  %1149 = vmatpush.bf16.msrb.mxu1 %v1427_v39  ;;  %v1430_v55 = vld [vmem:[%s2152_s12 + $0x10] sm:$0xff] }
 0x57d   : > { %v737_v59 = vsub.f32 1.0, %v736_v54  ;;  %v951_v60 = vmul.f32 %v950_v57, %v933_v18  ;;  %v1429_v57 = vld [vmem:[%s2152_s12 + $0x8] sm:$0xff] }
 0x57f   : > { %v738_v63 = vmul.f32 %v1554_v50, %v737_v59  ;;  %v952_v1 = vpack.c.bf16 %v951_v60, %v951_v60  ;;  %v1428_v59 = vld [vmem:[%s2152_s12] sm:$0xff] }
 0x580   : > { %1150 = vmatpush.bf16.msrb.mxu1 %v1426_v40 }
 0x581   : > { %v739_v3 = vadd.f32 %v1554_v50, %v738_v63  ;;  %954 = vrot.lane.b32.xlu0 %v952_v1, %s1769_s1  ;;  %s1419_s1 = sshll.u32 %s1878_s17, 3  ;;  %s1232_s17 = scalar_lea.sflag [#allocation5], %s517_s24 }
 0x582   : > { %s1242_s15 = scalar_lea.hbm %s2154_s14, %s1419_s1 }
 0x583   : > { %v743_v6 = vsel %vm742_vm3, %v1554_v50, %v739_v3  ;;  %v1534_v50 = vld [vmem:[%s2145_s5] ss:$0 sm:$0xff]  ;;  %s1246_s18 = sshll.u32 %s1242_s15, 4  ;;  %s1247_s18 = int_to_ptr.hbm [resolvable:$true] %s1246_s18 }
 0x584   : > { %v748_v7 = vsel %vm745_vm4, %v747_v4, %v743_v6  ;;  %s1697_s22 = sshra.s32 %s1247_s18, 4  ;;  %s1698_s22 = int_to_ptr.hbm [resolvable:$true] %s1697_s22 }
 0x585   : > { %v749_v56 = vmul.f32 %v748_v7, %v2042_v48  ;;  %p1704_p3 = scmp.lt.s32.totalorder %s1698_s22, %s2154_s14 }
 0x587   : > { %v750_v9 = vpack.c.bf16 %v749_v56, %v749_v56 }
 0x589   : > { %854 = vrot.lane.b32.xlu1 %v852_v8, %s1780_s20  ;;  %752 = vst.msk [vmem:[#allocation2] sm:$0xf] %vm751_vm5, %v750_v9  ;;  %vm1213_vm5 = vcmask 523264   ;;  %s1699_s20 = scalar_lea.hbm %s1698_s22, 8 }
 0x58a   : > { %p1700_p0 = scmp.ne.s32.totalorder %s1698_s22, %s1699_s20 }
 0x58c   : > { %p1701_p1 = pnand %p1700_p0, %p1895_p5 }
 0x58e   : > { %p1702_p2 = pneg %p1701_p1 }
 0x5e3   : > { %v1014_v11 = vpop.xlane.xlu1 %1013 }
 0x5e4   : > { %1555 = vrcp.f32 %v1014_v11  ;;  %v1048_v16 = vand.u32 2147483648, %v1014_v11  ;;  %v1046_v48 = vand.u32 2147483647, %v1014_v11  ;;  %vm1042_vm7 = vweird.f32 %v1014_v11 }
 0x5e6   : > { %v1049_v19 = vor.u32 1.1754944e-38, %v1048_v16  ;;  %vm1047_vm9 = vcmp.eq.f32.partialorder %v1046_v48, 8.507059e+37 }
 0x5ea   : > { %v1556_v12 = vpop.eup %1555 }
 0x5eb   : > { %v1038_v14 = vmul.f32 %v1556_v12, %v1014_v11  ;;  %vm1043_vm6 = vweird.f32 %v1556_v12 }
 0x5ec   : > { %vm1044_vm8 = vmor %vm1042_vm7, %vm1043_vm6 }
 0x5ed   : > { %v1039_v15 = vsub.f32 1.0, %v1038_v14  ;;  %v1536_v14 = vld [vmem:[%s2153_s13] ss:$0 sm:$0xff] }
 0x5ef   : > { %v1040_v17 = vmul.f32 %v1556_v12, %v1039_v15 }
 0x5f1   : > { %v1041_v18 = vadd.f32 %v1556_v12, %v1040_v17 }
 0x5f3   : > { %v1045_v20 = vsel %vm1044_vm8, %v1556_v12, %v1041_v18  ;;  %v955_v28 = vpop.permute.xlu0 %954 }
 0x5f4   : > { %v1033_v21 = vpop.f32.mrf.mxu3  ;;  %v1050_v22 = vsel %vm1047_vm9, %v1049_v19, %v1045_v20 }
 0x5f5   : > { %v1051_v23 = vmul.f32 %v1050_v22, %v1033_v21 }
 0x5f7   : > { %v1052_v24 = vpack.c.bf16 %v1051_v23, %v1051_v23 }
 0x5f9   : > { %1054 = vrot.lane.b32.xlu2 %v1052_v24, %s1781_s27  ;;  %s1703_s27 = scalar_lea.hbm %s2154_s14, 16 }
 0x5fa   : > { %p1705_p4 = scmp.lt.s32.totalorder %s1703_s27, %s1699_s20 }
 0x5fb   : > { %v855_v27 = vpop.permute.xlu1 %854 }
 0x5fc   : > { %858 = vst.msk [vmem:[#allocation2] sm:$0xf] %vm857_vm10, %v855_v27  ;;  %v1035_v29 = vpop.f32.mrf.mxu3  ;;  %p1706_p7 = por %p1705_p4, %p1704_p3 }
 0x5fd   : > { %958 = vst.msk [vmem:[#allocation2] sm:$0xf] %vm957_vm11, %v955_v28 }
 0x5fe   : > { %p1707_p8 = pnand %p1706_p7, %p1702_p2 }
 0x653   : > { %v1055_v31 = vpop.permute.xlu2 %1054 }
 0x654   : > { %1058 = vst.msk [vmem:[#allocation2] sm:$0xf] %vm1057_vm12, %v1055_v31 }
 0x65b   : > { %v1059_v32 = vld [vmem:[#allocation2] sm:$0xf] }
 0x65c   : > { %1390 = vmatmul.msk.bf16.vlgmr.msrb.gmra.mxu0 %vm528_vm0, %v1059_v32 }
 0x6d9   : > { %v1092_v25 = vpop.f32.mrf.mxu0 }
 0x6da   : > { %v1093_v34 = vadd.f32 %v1533_v33, %v1092_v25 }
 0x6dc   : > { %v1096_v35 = vadd.f32 %v1093_v34, %v1980_v26 }
 0x6de   : > { %v1098_v36 = vmul.f32 %v1096_v35, %v1096_v35 }
 0x6e0   : > { %v1099_v37 = vsel %vm528_vm0, %v1098_v36, 0.0 }
 0x6e1   : > { %v1094_v38 = vpop.f32.mrf.mxu0  ;;  %1100 = vadd.xlane.f32.xlu0 %v1099_v37 }
 0x754   : > { %v1101_v41 = vpop.xlane.xlu0 %1100 }
 0x755   : > { %v1102_v42 = vmul.f32 %v1101_v41, %v1968_v13  ;;  %v1431_v13 = vld [vmem:[%s2152_s12 + $0x18] sm:$0xff] }
 0x756   : > { %1221 = vmatpush.bf16.msrb.mxu2 %v1431_v13 }
 0x757   : > { %v1103_v43 = vadd.f32 1.1920929e-07, %v1102_v42 }
 0x759   : > { %1557 = vrsqrt.f32 %v1103_v43  ;;  %vm1110_vm14 = vweird.f32 %v1103_v43 }
 0x75a   : > { %1222 = vmatpush.bf16.msrb.mxu2 %v1430_v55 }
 0x75e   : > { %1223 = vmatpush.bf16.msrb.mxu2 %v1429_v57 }
 0x75f   : > { %v1558_v44 = vpop.eup %1557 }
 0x760   : > { %v1105_v45 = vmul.f32 %v1558_v44, %v1103_v43  ;;  %vm1111_vm13 = vweird.f32 %v1558_v44 }
 0x761   : > { %vm1112_vm15 = vmor %vm1110_vm14, %vm1111_vm13 }
 0x762   : > { %v1106_v46 = vmul.f32 %v1558_v44, %v1105_v45  ;;  %1224 = vmatpush.bf16.msrb.mxu2 %v1428_v59 }
 0x764   : > { %v1107_v47 = vmul.f32 0.5, %v1106_v46 }
 0x766   : > { %v1108_v49 = vsub.f32 1.5, %v1107_v47 }
 0x768   : > { %v1109_v26 = vmul.f32 %v1558_v44, %v1108_v49 }
 0x76a   : > { %v1113_v51 = vsel %vm1112_vm15, %v1558_v44, %v1109_v26 }
 0x76b   : > { %v1114_v52 = vmul.f32 %v1113_v51, %v1096_v35 }
 0x76d   : > { %v1118_v53 = vmul.f32 %v1534_v50, %v1114_v52 }
 0x76f   : > { %v1119_v54 = vpack.c.bf16 %v1118_v53, %v1118_v53 }
 0x771   : > { %1399 = vmatmul.msk.bf16.vlgmr.msrb.gmra.mxu1 %vm528_vm0, %v1119_v54 }
 0x7ee   : > { %v1152_v60 = vpop.f32.mrf.mxu1 }
 0x7ef   : > { %v1153_v61 = vadd.f32 %v1535_v58, %v1152_v60 }
 0x7f1   : > { %v1400_v62 = vmul.f32 -1.442695, %v1153_v61 }
 0x7f3   : > { %1559 = vpow2.f32 %v1400_v62 }
 0x7f6   : > { %v1154_v63 = vpop.f32.mrf.mxu1 }
 0x7f9   : > { %v1560_v0 = vpop.eup %1559 }
 0x7fa   : > { %v1159_v1 = vadd.f32 1.0, %v1560_v0 }
 0x7fc   : > { %1561 = vrcp.f32 %v1159_v1  ;;  %v1171_v5 = vand.u32 2147483648, %v1159_v1  ;;  %v1169_v7 = vand.u32 2147483647, %v1159_v1  ;;  %vm1165_vm2 = vweird.f32 %v1159_v1 }
 0x7fe   : > { %v1172_v8 = vor.u32 1.1754944e-38, %v1171_v5  ;;  %vm1170_vm4 = vcmp.eq.f32.partialorder %v1169_v7, 8.507059e+37 }
 0x802   : > { %v1562_v2 = vpop.eup %1561 }
 0x803   : > { %v1161_v3 = vmul.f32 %v1562_v2, %v1159_v1  ;;  %vm1166_vm1 = vweird.f32 %v1562_v2 }
 0x804   : > { %vm1167_vm3 = vmor %vm1165_vm2, %vm1166_vm1 }
 0x805   : > { %v1162_v4 = vsub.f32 1.0, %v1161_v3 }
 0x807   : > { %v1163_v6 = vmul.f32 %v1562_v2, %v1162_v4 }
 0x809   : > { %v1164_v56 = vadd.f32 %v1562_v2, %v1163_v6 }
 0x80b   : > { %v1168_v9 = vsel %vm1167_vm3, %v1562_v2, %v1164_v56 }
 0x80c   : > { %v1173_v10 = vsel %vm1170_vm4, %v1172_v8, %v1168_v9 }
 0x80d   : > { %v1175_v11 = vmul.f32 %v1173_v10, %v1153_v61 }
 0x80f   : > { %v1176_v12 = vpack.c.bf16 %v1175_v11, %v1175_v11 }
 0x811   : > { %1417 = vmatmul.msk.bf16.vlgmr.msrb.gmra.mxu2 %vm1213_vm5, %v1176_v12 }
 0x894   : > { %v1226_v15 = vpop.f32.mrf.mxu2 }
 0x895   : > { %v1227_v16 = vadd.f32 %v1536_v14, %v1226_v15 }
 0x897   : > { %1230 = vst.msk [vmem:[%s519_s25] sm:$0xff] %vm528_vm0, %v1227_v16 }
 0x898   : > { %1710 = shalt.err (!%p1707_p8)
}
 0x899   : > { %1448 = dma.vmem_to_hbm [thread:$0]  (%p1895_p5), %s1245_s28, 128, %s1247_s18, %s1232_s17  }
 0x89c   : > { %v1228_v17 = vpop.f32.mrf.mxu2 }
 0x89d PF: > { %s2177_s24 = sld [smem:[#allocation18_spill]] }
 0x89e   : > { %s2178_s3 = sld [smem:[#allocation16_spill]] }
 0x8a3   : > { %p1475_p9 = scmp.ge.s32.totalorder %s2177_s24, 2 }
 0x8a4   : > { %s1258_s15 = sand.u32 1, %s2178_s3  }
 0x8a5   : > { %p1464_p10 = pnand %p1475_p9, %p1899_p6  ;;  %s1259_s16 = scalar_lea.sflag [#allocation5], %s1258_s15 }
 0x8a7   : > { %p1465_p11 = pneg %p1464_p10 }
 0x8a9   : > { %1740 = dma.done.wait (%p1465_p11), %s1259_s16, 128  }
 0x8aa   : > { %1742 = vsyncadd (%p1465_p11), %s1259_s16, 4294967168  ;;  %s2180_s16 = sld [smem:[#allocation19_spill]]  ;;  %s2183_s29 = smov %s1749_s30 }
 0x8ab   : > { %s2181_s19 = sld [smem:[#allocation17_spill]] }
 0x8ac   : > { %s2182_s15 = sld [smem:[#allocation20_spill]] }
 0x8b0   : > { %p27_p12 = scmp.ge.s32.totalorder %s2180_s16, 4  }
 0x8b1   : > { %s2184_s30 = smov %s2181_s19 }
 0x8b2   :  { %29 = sbr.rel (!%p27_p12) target bundleno = 10 (0xa), region = 128 }
 0x8b7   :  { %1265 = vsyncpa [#allocation4], 1 }
 0x8b8   :  { %1267 = vsyncpa [#allocation4 + $0x1], 1 }
 0x8b9   :  { %1268 = vsyncpa [#allocation7], 1 }
 0x8ba   :  { %1269 = vsyncpa [#allocation10], 1 }
 0x8bb   :  { %1270 = vsyncpa [#allocation5], 1 }
 0x8bc   :  { %1272 = vsyncpa [#allocation5 + $0x1], 1 }

// kernel: tpu_custom_call.1
= control target key start
LH: loop header
LB: loop body
LE: loop exit
PB: predicated region body
PF: predicated region fallthrough
CT: control target
= control target key end

     0   :  { %s2140_s0 = inlined_call_operand.vmem [shape: f32[2,8,32], index: 0, kind: input, shape index: {}]   ;;  %s2141_s1 = inlined_call_operand.hbm [shape: f32[8,8], index: 1, kind: input, shape index: {}]   ;;  %s2142_s2 = inlined_call_operand.hbm [shape: f32[8,16], index: 2, kind: input, shape index: {}]   ;;  %s2143_s3 = inlined_call_operand.hbm [shape: f32[8,16], index: 3, kind: input, shape index: {}]   ;;  %s2144_s4 = inlined_call_operand.vmem [shape: f32[1,32], index: 4, kind: input, shape index: {}]   ;;  %s2145_s5 = inlined_call_operand.vmem [shape: f32[1,32], index: 5, kind: input, shape index: {}]   ;;  %s2146_s6 = inlined_call_operand.vmem [shape: bf16[32,96], index: 6, kind: input, shape index: {}]   ;;  %s2147_s7 = inlined_call_operand.vmem [shape: f32[1,96], index: 7, kind: input, shape index: {}]   ;;  %s2148_s8 = inlined_call_operand.vmem [shape: bf16[32,32], index: 8, kind: input, shape index: {}]   ;;  %s2149_s9 = inlined_call_operand.vmem [shape: f32[1,32], index: 9, kind: input, shape index: {}]   ;;  %s2150_s10 = inlined_call_operand.hbm [shape: bf16[32,64], index: 10, kind: input, shape index: {}]   ;;  %s2151_s11 = inlined_call_operand.vmem [shape: f32[1,64], index: 11, kind: input, shape index: {}]   ;;  %s2152_s12 = inlined_call_operand.vmem [shape: bf16[64,32], index: 12, kind: input, shape index: {}]   ;;  %s2153_s13 = inlined_call_operand.vmem [shape: f32[1,32], index: 13, kind: input, shape index: {}]   ;;  %s2154_s14 = inlined_call_operand.hbm [shape: f32[2,8,32], index: 14, kind: output, shape index: {}]  }
   0x1   :  { %2161 = sst [smem:[#allocation22_spill]] %s2141_s1 }
   0x2   :  { %2162 = sst [smem:[#allocation23_spill]] %s2142_s2 }
   0x3   :  { %2163 = sst [smem:[#allocation24_spill]] %s2143_s3 }
   0x4   :  { %19 = vsyncpa [#allocation4], 0 }
   0x5   :  { %20 = vsyncpa [#allocation7], 0 }
   0x6   :  { %21 = vsyncpa [#allocation10], 0 }
   0x7   :  { %22 = vsyncpa [#allocation5], 0 }
   0x8   :  { %24 = vsyncpa [#allocation5 + $0x1], 0  ;;  %s1857_s29 = smov 0   ;;  %s1859_s30 = smov 0  }
   0x9   :  { %s1861_s15 = smov 0   ;;  %s1863_s16 = smov 0  }
   0xa LB: > { %2164 = sst [smem:[#allocation16_spill]] %s1745_s29  ;;  %s1878_s17 = sadd.s32 4294967295, %s1757_s16   ;;  %s1757_s16 = sphi %s1863_s16, %s2180_s16   ;;  %s1753_s15 = sphi %s1861_s15, %s2182_s15   ;;  %s1749_s30 = sphi %s1859_s30, %s2184_s30   ;;  %s1745_s29 = sphi %s1857_s29, %s2183_s29  }
   0xb   : > { %2165 = sst [smem:[#allocation17_spill]] %s1753_s15  ;;  %s1347_s18 = sadd.s32 4294967294, %s1757_s16  }
   0xc   : > { %2166 = sst [smem:[#allocation18_spill]] %s1757_s16  ;;  %s1882_s19 = sadd.s32 1, %s1757_s16  }
   0xd   : > { %2167 = sst [smem:[#allocation19_spill]] %s1882_s19  ;;  %s336_s20 = sadd.s32 1, %s1753_s15 }
   0xe   : > { %s333_s21 = ssub.s32 %s1757_s16, %s1882_s19  ;;  %p346_p0 = scmp.ne.s32.totalorder %s1753_s15, %s1749_s30 }
   0xf   : > { %p334_p1 = scmp.eq.s32.totalorder %s333_s21, 0  ;;  %p347_p2 = scmp.eq.s32.totalorder %s1878_s17, 1 }
  0x10   : > { %p352_p3 = scmp.ne.s32.totalorder %s1749_s30, %s1745_s29  ;;  %p353_p4 = scmp.eq.s32.totalorder %s1347_s18, 1 }
  0x11   : > { %s1893_s22 = scalar_select %p334_p1, %s1753_s15, %s336_s20  }
  0x12   : > { %p1895_p5 = por %p347_p2, %p346_p0  ;;  %p1899_p6 = por %p353_p4, %p352_p3 }
  0x13   : > { %2168 = sst [smem:[#allocation20_spill]] %s1893_s22  ;;  %p1348_p7 = scmp.ge.s32.totalorder %s1757_s16, 1 }
  0x14   : > { %s2170_s24 = scalar_select %p1899_p6, 1, 0 }
  0x15   : > { %p360_p8 = scmp.lt.s32.totalorder %s1757_s16, 3  ;;  %p1467_p9 = scmp.eq.s32.totalorder %s1878_s17, 0 }
  0x16   : > { %2171 = sst [smem:[#allocation21_spill]] %s2170_s24  ;;  %s1759_s18 = smov [#allocation6]  }
  0x17   : > { %p1906_p10 = pnand %p1348_p7, %p360_p8  ;;  %s2173_s2 = sld [smem:[#allocation23_spill]] }
  0x18   : > { %s386_s20 = sshll.u32 %s1759_s18, 4  ;;  %s2174_s1 = sld [smem:[#allocation22_spill]]  ;;  %s387_s20 = int_to_ptr.vmem [resolvable:$true] %s386_s20 }
  0x19   : > { %p1450_p11 = pneg %p1906_p10  ;;  %s2176_s3 = sld [smem:[#allocation24_spill]] }
  0x1a   : > { %s1760_s24 = smov [#allocation3]   ;;  %s1761_s29 = smov [#allocation8]  }
  0x1b   : > { %p1920_p12 = pnand %p1467_p9, %p1450_p11  ;;  %s374_s18 = sshll.u32 %s1760_s24, 4  ;;  %s375_s18 = int_to_ptr.vmem [resolvable:$true] %s374_s18 }
  0x1c   : > { %s398_s16 = sshll.u32 %s1761_s29, 4  ;;  %s1762_s26 = smov [#allocation9]   ;;  %s399_s16 = int_to_ptr.vmem [resolvable:$true] %s398_s16 }
  0x1d   : > { %s384_s28 = sshll.u32 %s2173_s2, 4  ;;  %s427_s27 = sshll.u32 %s1762_s26, 4  ;;  %s385_s28 = int_to_ptr.hbm [resolvable:$true] %s384_s28  ;;  %s428_s27 = int_to_ptr.vmem [resolvable:$true] %s427_s27 }
  0x1e   : > { %s372_s15 = sshll.u32 %s2174_s1, 4  ;;  %s425_s1 = sshll.u32 %s2150_s10, 4  ;;  %s373_s15 = int_to_ptr.hbm [resolvable:$true] %s372_s15  ;;  %s426_s1 = int_to_ptr.hbm [resolvable:$true] %s425_s1 }
  0x1f   : > { %s396_s2 = sshll.u32 %s2176_s3, 4  ;;  %s1763_s24 = smov 64   ;;  %s397_s2 = int_to_ptr.hbm [resolvable:$true] %s396_s2 }
  0x20   : > { %1456 = dma.hbm_to_vmem [thread:$0]  (!%p1920_p12), %s385_s28, 128, %s387_s20, [#allocation7]  }
  0x21   : > { %1453 = dma.hbm_to_vmem [thread:$0]  (!%p1920_p12), %s373_s15, 128, %s375_s18, [#allocation4]  }
  0x22   : > { %1459 = dma.hbm_to_vmem [thread:$0]  (!%p1920_p12), %s397_s2, 128, %s399_s16, [#allocation7]  }
  0x23   : > { %s1764_s3 = smov 4   ;;  %459 = sbr.rel (%p1906_p10) target bundleno = 2205 (0x89d), region = 76 }
  0x24   : > { %1462 = dma.hbm_to_vmem [thread:$0]  (!%p1920_p12), %s426_s1, 256, %s428_s27, [#allocation10], %s1763_s24, %s1763_s24, %s1764_s3  }
  0x28   : > { %1728 = dma.done.wait (%p1467_p9), [#allocation4], 128  }
  0x29   : > { %1730 = vsyncadd (%p1467_p9), [#allocation4], 4294967168 }
  0x2a   : > { %1732 = dma.done.wait (%p1467_p9), [#allocation7], 256  }
  0x2b   : > { %1734 = vsyncadd (%p1467_p9), [#allocation7], 4294967040 }
  0x2c   : > { %1736 = dma.done.wait (%p1467_p9), [#allocation10], 256  }
  0x2d   : > { %1738 = vsyncadd (%p1467_p9), [#allocation10], 4294967040  ;;  %p520_p13 = scmp.lt.s32.totalorder %s1878_s17, 1  ;;  %vm528_vm0 = vcmask 261120   ;;  %v1765_v3 = vmov 32.0   ;;  %v1423_v7 = vld [vmem:[%s2146_s6 + $0x8] sm:$0xff] }
  0x2e   : > { %1537 = vrcp.f32 %v1765_v3  ;;  %586 = vmatpush.bf16.msra.mxu0 %v1423_v7  ;;  %v1422_v9 = vld [vmem:[%s2146_s6] sm:$0xff]  ;;  %v1964_v11 = vld [vmem:[#allocation6] sm:$0xff]  ;;  %v1966_v12 = vld [vmem:[#allocation8] sm:$0xff]  ;;  %s1766_s20 = smov 48   ;;  %s1767_s18 = smov 32   ;;  %vm654_vm5 = vcmask 31744  }
  0x2f   : > { %s521_s1 = scalar_select %p520_p13, %s1878_s17, 1  ;;  %638 = vrot.lane.b32.xlu1 %v1964_v11, %s1766_s20  ;;  %v1531_v23 = vld [vmem:[%s2144_s4] ss:$0 sm:$0xff]  ;;  %vm718_vm6 = vcmask 1043456   ;;  %vm699_vm7 = vcmask 64512  }
  0x30   : > { %v1532_v28 = vld [vmem:[%s2147_s7] ss:$0 sm:$0xff]  ;;  %s1768_s24 = smov 112   ;;  %s1771_s3 = smov 64  }
  0x31   : > { %s1360_s2 = sshll.u32 %s521_s1, 3  ;;  %s1769_s1 = smov 16  }
  0x32   : > { %s523_s15 = scalar_lea.vmem %s2140_s0, %s1360_s2  ;;  %587 = vmatpush.bf16.msra.mxu0 %v1422_v9  ;;  %s1770_s2 = smov 96  }
  0x33   : > { %v525_v0 = vld [vmem:[%s523_s15] sm:$0xff]  ;;  %s1772_s29 = smov 92   ;;  %s1773_s15 = smov 124  }
  0x34   : > { %v527_v1 = vmul.f32 %v525_v0, %v525_v0  ;;  %v1538_v4 = vpop.eup %1537  ;;  %s1774_s16 = smov 88   ;;  %s1775_s19 = smov 120  }
  0x35   : > { %v533_v5 = vmul.f32 32.0, %v1538_v4  ;;  %vm537_vm1 = vweird.f32 %v1538_v4  ;;  %s1776_s25 = smov 84   ;;  %s1777_s28 = smov 116  }
  0x36   : > { %v529_v2 = vsel %vm528_vm0, %v527_v1, 0.0  ;;  %s1779_s22 = smov 40   ;;  %s1781_s27 = smov 24  }
  0x37   : > { %530 = vadd.xlane.f32.xlu0 %v529_v2  ;;  %v534_v6 = vsub.f32 1.0, %v533_v5  ;;  %620 = vrot.lane.b32.xlu1 %v1964_v11, %s1767_s18 }
  0x39   : > { %v535_v8 = vmul.f32 %v1538_v4, %v534_v6 }
  0x3b   : > { %v536_v10 = vadd.f32 %v1538_v4, %v535_v8 }
  0x3d   : > { %v1968_v13 = vsel %vm537_vm1, %v1538_v4, %v536_v10 }
  0x4b   : > { %624 = vrot.lane.b32.xlu0 %v1966_v12, %s1766_s20 }
  0xa1   : > { %v639_v32 = vpop.permute.xlu1 %638 }
  0xa9   : > { %v621_v36 = vpop.permute.xlu1 %620 }
  0xaa   : > { %v531_v14 = vpop.xlane.xlu0 %530 }
  0xab   : > { %v539_v15 = vmul.f32 %v1968_v13, %v531_v14 }
  0xad   : > { %v540_v16 = vadd.f32 1.1920929e-07, %v539_v15 }
  0xaf   : > { %1539 = vrsqrt.f32 %v540_v16  ;;  %vm547_vm3 = vweird.f32 %v540_v16 }
  0xb5   : > { %v1540_v17 = vpop.eup %1539 }
  0xb6   : > { %v542_v18 = vmul.f32 %v1540_v17, %v540_v16  ;;  %vm548_vm2 = vweird.f32 %v1540_v17 }
  0xb7   : > { %vm549_vm4 = vmor %vm547_vm3, %vm548_vm2 }
  0xb8   : > { %v543_v19 = vmul.f32 %v1540_v17, %v542_v18 }
  0xba   : > { %v544_v20 = vmul.f32 0.5, %v543_v19 }
  0xbc   : > { %v545_v21 = vsub.f32 1.5, %v544_v20 }
  0xbd   : > { %v625_v30 = vpop.permute.xlu0 %624 }
  0xbe   : > { %v546_v22 = vmul.f32 %v1540_v17, %v545_v21 }
  0xc0   : > { %v550_v24 = vsel %vm549_vm4, %v1540_v17, %v546_v22 }
  0xc1   : > { %v551_v25 = vmul.f32 %v550_v24, %v525_v0 }
  0xc3   : > { %v1980_v26 = vmul.f32 %v1531_v23, %v551_v25  ;;  %v2025_v25 = vld [vmem:[#allocation3] sm:$0xff] }
  0xc5   : > { %v556_v27 = vpack.c.bf16 %v1980_v26, %v1980_v26 }
  0xc7   : > { %1369 = vmatmul.msk.bf16.vlgmr.msra.gmra.mxu0 %vm528_vm0, %v556_v27 }
 0x144   : > { %v589_v29 = vpop.f32.mrf.mxu0 }
 0x145   : > { %v590_v31 = vadd.f32 %v1532_v28, %v589_v29 }
 0x147   : > { %v627_v33 = vmul.f32 %v625_v30, %v590_v31  ;;  %v641_v34 = vmul.f32 %v639_v32, %v590_v31  ;;  %v623_v37 = vmul.f32 %v621_v36, %v590_v31  ;;  %v648_v52 = vpack.c.bf16 %v590_v31, %v590_v31 }
 0x148   : > { %v608_v59 = vmul.f32 %v1966_v12, %v590_v31  ;;  %v596_v1 = vmul.f32 %v1964_v11, %v590_v31 }
 0x149   : > { %643 = vrot.lane.b32.xlu1 %v641_v34, %s1768_s24  ;;  %629 = vrot.lane.b32.xlu2 %v627_v33, %s1768_s24  ;;  %v711_v55 = vunpack.c.l.b16 %v648_v52 }
 0x14b   : > { %v2001_v56 = vpack.c.b16 %v711_v55, %v711_v55 }
 0x14c   : > { %v591_v35 = vpop.f32.mrf.mxu0 }
 0x151   : > { %610 = vrot.lane.b32.xlu1 %v1964_v11, %s1769_s1  ;;  %634 = vrot.lane.b32.xlu2 %v1966_v12, %s1767_s18  ;;  %s1778_s18 = smov 56  }
 0x159   : > { %598 = vrot.lane.b32.xlu2 %v1966_v12, %s1769_s1 }
 0x1a3   : > { %v630_v38 = vpop.permute.xlu2 %629 }
 0x1a4   : > { %v632_v39 = vsub.f32 %v623_v37, %v630_v38 }
 0x1a6   : > { %v633_v40 = vpack.c.bf16 %v632_v39, %v632_v39 }
 0x1a8   : > { %v675_v41 = vunpack.c.l.b16 %v633_v40 }
 0x1aa   : > { %v1996_v42 = vpack.c.b16 %v675_v41, %v675_v41 }
 0x1ab   : > { %v635_v43 = vpop.permute.xlu2 %634 }
 0x1ac   : > { %677 = vrot.lane.b32.xlu2 %v1996_v42, %s1770_s2  ;;  %v637_v46 = vmul.f32 %v635_v43, %v590_v31 }
 0x1b3   : > { %v599_v44 = vpop.permute.xlu2 %598 }
 0x1b4   : > { %v601_v45 = vmul.f32 %v599_v44, %v590_v31 }
 0x1b6   : > { %603 = vrot.lane.b32.xlu0 %v601_v45, %s1768_s24 }
 0x1bb   : > { %v644_v47 = vpop.permute.xlu1 %643 }
 0x1bc   : > { %v646_v48 = vadd.f32 %v644_v47, %v637_v46 }
 0x1be   : > { %v647_v49 = vpack.c.bf16 %v646_v48, %v646_v48 }
 0x1c0   : > { %v650_v50 = vunpack.c.l.b16 %v647_v49 }
 0x1c2   : > { %v651_v51 = vpack.c.b16 %v650_v50, %v650_v50 }
 0x1c3   : > { %v611_v53 = vpop.permute.xlu1 %610 }
 0x1c4   : > { %v613_v54 = vmul.f32 %v611_v53, %v590_v31  ;;  %652 = vrot.lane.b32.xlu1 %v651_v51, %s1770_s2 }
 0x1c6   : > { %615 = vrot.lane.b32.xlu2 %v613_v54, %s1768_s24  ;;  %s517_s24 = sand.u32 1, %s1749_s30  }
 0x1c7   : > { %s1359_s2 = sshll.u32 %s517_s24, 3 }
 0x1cc   : > { %713 = vrot.lane.b32.xlu1 %v2001_v56, %s1771_s3 }
 0x1ce   : > { %758 = vrot.lane.b32.xlu2 %v651_v51, %s1772_s29 }
 0x1d4   : > { %784 = vrot.lane.b32.xlu1 %v1996_v42, %s1772_s29 }
 0x206   : > { %v678_v57 = vpop.permute.xlu2 %677 }
 0x207   : > { %v683_v58 = vsel %vm654_vm5, %v678_v57, 0 }
 0x208   : > { %692 = vmatpush.bf16.xpose.msra.mxu2 %v683_v58 }
 0x220   : > { %v616_v60 = vpop.permute.xlu2 %615 }
 0x221   : > { %v618_v61 = vadd.f32 %v616_v60, %v608_v59 }
 0x223   : > { %v619_v62 = vpack.c.bf16 %v618_v61, %v618_v61 }
 0x225   : > { %v754_v63 = vunpack.c.l.b16 %v619_v62 }
 0x227   : > { %v755_v0 = vpack.c.b16 %v754_v63, %v754_v63 }
 0x228   : > { %v604_v2 = vpop.permute.xlu0 %603  ;;  %v759_v9 = vpop.permute.xlu2 %758 }
 0x229   : > { %v606_v3 = vsub.f32 %v596_v1, %v604_v2  ;;  %756 = vrot.lane.b32.xlu2 %v755_v0, %s1773_s15  ;;  %v764_v12 = vsel %vm654_vm5, %v759_v9, 0 }
 0x22b   : > { %v607_v4 = vpack.c.bf16 %v606_v3, %v606_v3 }
 0x22d   : > { %v780_v5 = vunpack.c.l.b16 %v607_v4  ;;  %1371 = vmatmul.msk.bf16.vlgmr.msra.gmra.mxu2 %vm654_vm5, %v607_v4 }
 0x22f   : > { %v2009_v6 = vpack.c.b16 %v780_v5, %v780_v5 }
 0x231   : > { %782 = vrot.lane.b32.xlu1 %v2009_v6, %s1773_s15 }
 0x236   : > { %v653_v7 = vpop.permute.xlu1 %652 }
 0x237   : > { %v659_v8 = vsel %vm654_vm5, %v653_v7, 0 }
 0x238   : > { %668 = vmatpush.bf16.xpose.msra.mxu1 %v659_v8 }
 0x239   : > { %861 = vrot.lane.b32.xlu1 %v651_v51, %s1774_s16 }
 0x23e   : > { %v714_v10 = vpop.permute.xlu1 %713 }
 0x23f   : > { %1370 = vmatmul.msk.bf16.vlgmr.msra.gmra.mxu1 %vm654_vm5, %v619_v62  ;;  %v720_v11 = vsel %vm718_vm6, %v714_v10, 0 }
 0x240   : > { %729 = vmatpush.bf16.msra.mxu3 %v720_v11 }
 0x241   : > { %859 = vrot.lane.b32.xlu1 %v755_v0, %s1775_s19 }
 0x244   : > { %773 = vmatpush.bf16.xpose.msrb.mxu3 %v764_v12 }
 0x246   : > { %v785_v14 = vpop.permute.xlu1 %784 }
 0x247   : > { %v790_v15 = vsel %vm654_vm5, %v785_v14, 0 }
 0x248   : > { %799 = vmatpush.bf16.xpose.msrb.mxu0 %v790_v15 }
 0x249   : > { %984 = vrot.lane.b32.xlu1 %v1996_v42, %s1776_s25 }
 0x251   : > { %884 = vrot.lane.b32.xlu1 %v1996_v42, %s1774_s16 }
 0x259   : > { %961 = vrot.lane.b32.xlu1 %v651_v51, %s1776_s25  ;;  %s519_s25 = scalar_lea.vmem [#allocation11], %s1359_s2 }
 0x261   : > { %959 = vrot.lane.b32.xlu1 %v755_v0, %s1777_s28 }
 0x283   : > { %v757_v46 = vpop.permute.xlu2 %756 }
 0x2a3   : > { %v783_v16 = vpop.permute.xlu1 %782 }
 0x2a4   : > { %1374 = vmatmul.msk.bf16.vlgmr.msrb.gmra.mxu0 %vm654_vm5, %v783_v16 }
 0x2ab   : > { %v862_v17 = vpop.permute.xlu1 %861 }
 0x2ac   : > { %v867_v18 = vsel %vm654_vm5, %v862_v17, 0 }
 0x2ad   : > { %876 = vmatpush.bf16.xpose.msrb.mxu2 %v867_v18 }
 0x2b0   : > { %v694_v19 = vpop.f32.mrf.mxu2 }
 0x2b3   : > { %v860_v20 = vpop.permute.xlu1 %859 }
 0x2b4   : > { %1376 = vmatmul.msk.bf16.vlgmr.msrb.gmra.mxu2 %vm654_vm5, %v860_v20 }
 0x2b8   : > { %v696_v21 = vpop.f32.mrf.mxu2 }
 0x2bb   : > { %v985_v22 = vpop.permute.xlu1 %984 }
 0x2bc   : > { %v990_v23 = vsel %vm654_vm5, %v985_v22, 0  ;;  %v670_v24 = vpop.f32.mrf.mxu1 }
 0x2bd   : > { %v695_v27 = vadd.f32 %v694_v19, %v670_v24  ;;  %999 = vmatpush.bf16.xpose.msra.mxu2 %v990_v23 }
 0x2bf   : > { %v698_v28 = vadd.f32 %v695_v27, %v2025_v25 }
 0x2c1   : > { %v700_v29 = vsel %vm699_vm7, %v698_v28, -inf }
 0x2c2   : > { %701 = vmax.xlane.f32.xlu0 %v700_v29 }
 0x2c3   : > { %v885_v37 = vpop.permute.xlu1 %884 }
 0x2c4   : > { %v672_v30 = vpop.f32.mrf.mxu1  ;;  %v890_v41 = vsel %vm654_vm5, %v885_v37, 0 }
 0x2cb   : > { %v962_v42 = vpop.permute.xlu1 %961 }
 0x2cc   : > { %v967_v45 = vsel %vm654_vm5, %v962_v42, 0 }
 0x2d3   : > { %v960_v0 = vpop.permute.xlu1 %959 }
 0x2d6   : > { %816 = vrot.lane.b32.xlu0 %v2001_v56, %s1778_s18 }
 0x2de   : > { %882 = vrot.lane.b32.xlu0 %v2009_v6, %s1775_s19 }
 0x321   : > { %v801_v31 = vpop.f32.mrf.mxu0 }
 0x329   : > { %v803_v32 = vpop.f32.mrf.mxu0 }
 0x335   : > { %v702_v33 = vpop.xlane.xlu0 %701 }
 0x336   : > { %v703_v34 = vsub.f32 %v698_v28, %v702_v33 }
 0x337   : > { %v878_v35 = vpop.f32.mrf.mxu2 }
 0x338   : > { %v704_v36 = vmul.f32 1.442695, %v703_v34 }
 0x33a   : > { %1541 = vpow2.f32 %v704_v36 }
 0x33f   : > { %v880_v38 = vpop.f32.mrf.mxu2 }
 0x340   : > { %v2032_v39 = vpop.eup %1541 }
 0x341   : > { %v709_v40 = vpack.c.bf16 %v2032_v39, %v2032_v39  ;;  %v706_v28 = vsel %vm699_vm7, %v2032_v39, 0.0 }
 0x343   : > { %1372 = vmatmul.msk.bf16.vlgmr.msra.gmra.mxu3 %vm699_vm7, %v709_v40 }
 0x344   : > { %899 = vmatpush.bf16.xpose.msra.mxu3 %v890_v41 }
 0x348   : > { %v817_v43 = vpop.permute.xlu0 %816 }
 0x349   : > { %v822_v44 = vsel %vm718_vm6, %v817_v43, 0 }
 0x34a   : > { %831 = vmatpush.bf16.msrb.mxu1 %v822_v44 }
 0x34e   : > { %976 = vmatpush.bf16.xpose.msra.mxu1 %v967_v45 }
 0x350   : > { %v883_v47 = vpop.permute.xlu0 %882 }
 0x353   : > { %1373 = vmatmul.msk.bf16.vlgmr.msrb.gmra.mxu3 %vm654_vm5, %v757_v46 }
 0x363   : > { %1377 = vmatmul.msk.bf16.vlgmr.msra.gmra.mxu3 %vm654_vm5, %v883_v47 }
 0x3c6   : > { %v2042_v48 = vpop.f32.mrf.mxu3 }
 0x3ce   : > { %v733_v49 = vpop.f32.mrf.mxu3 }
 0x3d6   : > { %v775_v50 = vpop.f32.mrf.mxu3 }
 0x3d7   : > { %v802_v51 = vadd.f32 %v801_v31, %v775_v50 }
 0x3d9   : > { %v805_v52 = vadd.f32 %v802_v51, %v2025_v25 }
 0x3db   : > { %v806_v53 = vsel %vm699_vm7, %v805_v52, -inf }
 0x3dc   : > { %807 = vmax.xlane.f32.xlu2 %v806_v53 }
 0x3de   : > { %v777_v54 = vpop.f32.mrf.mxu3 }
 0x3e6   : > { %v901_v55 = vpop.f32.mrf.mxu3 }
 0x3e7   : > { %v902_v57 = vadd.f32 %v901_v55, %v878_v35 }
 0x3e9   : > { %v905_v58 = vadd.f32 %v902_v57, %v2025_v25 }
 0x3eb   : > { %v906_v59 = vsel %vm699_vm7, %v905_v58, -inf }
 0x3ec   : > { %907 = vmax.xlane.f32.xlu1 %v906_v59 }
 0x3ee   : > { %v903_v60 = vpop.f32.mrf.mxu3 }
 0x3f4   : > { %982 = vrot.lane.b32.xlu2 %v2009_v6, %s1777_s28  ;;  %s1244_s28 = sshll.u32 %s519_s25, 4  ;;  %s1245_s28 = int_to_ptr.vmem [resolvable:$true] %s1244_s28 }
 0x3fc   : > { %1016 = vrot.lane.b32.xlu2 %v2001_v56, %s1779_s22 }
 0x404   : > { %916 = vrot.lane.b32.xlu2 %v2001_v56, %s1766_s20  ;;  %s1780_s20 = smov 8  }
 0x44f   : > { %v808_v61 = vpop.xlane.xlu2 %807 }
 0x450   : > { %v809_v62 = vsub.f32 %v805_v52, %v808_v61 }
 0x452   : > { %v810_v63 = vmul.f32 1.442695, %v809_v62 }
 0x454   : > { %1543 = vpow2.f32 %v810_v63 }
 0x457   : > { %v983_v1 = vpop.permute.xlu2 %982 }
 0x458   : > { %1380 = vmatmul.msk.bf16.vlgmr.msra.gmra.mxu2 %vm654_vm5, %v983_v1 }
 0x45a   : > { %v1544_v2 = vpop.eup %1543 }
 0x45b   : > { %v812_v3 = vsel %vm699_vm7, %v1544_v2, 0.0  ;;  %v815_v4 = vpack.c.bf16 %v1544_v2, %v1544_v2 }
 0x45c   : > { %813 = vadd.xlane.f32.xlu2 %v812_v3 }
 0x45d   : > { %1375 = vmatmul.msk.bf16.vlgmr.msrb.gmra.mxu1 %vm699_vm7, %v815_v4 }
 0x45f   : > { %v1017_v5 = vpop.permute.xlu2 %1016  ;;  %v908_v6 = vpop.xlane.xlu1 %907 }
 0x460   : > { %v1022_v7 = vsel %vm718_vm6, %v1017_v5, 0  ;;  %v909_v56 = vsub.f32 %v905_v58, %v908_v6 }
 0x461   : > { %1031 = vmatpush.bf16.msrb.mxu3 %v1022_v7 }
 0x462   : > { %v910_v8 = vmul.f32 1.442695, %v909_v56 }
 0x464   : > { %1545 = vpow2.f32 %v910_v8 }
 0x467   : > { %v917_v9 = vpop.permute.xlu2 %916 }
 0x468   : > { %v922_v10 = vsel %vm718_vm6, %v917_v9, 0 }
 0x469   : > { %931 = vmatpush.bf16.msra.mxu0 %v922_v10  ;;  %v1425_v10 = vld [vmem:[%s2148_s8 + $0x8] sm:$0xff] }
 0x46a   : > { %v1546_v11 = vpop.eup %1545 }
 0x46b   : > { %v915_v12 = vpack.c.bf16 %v1546_v11, %v1546_v11  ;;  %v912_v27 = vsel %vm699_vm7, %v1546_v11, 0.0 }
 0x46d   : > { %1378 = vmatmul.msk.bf16.vlgmr.msra.gmra.mxu0 %vm699_vm7, %v915_v12  ;;  %1379 = vmatmul.msk.bf16.vlgmr.msra.gmra.mxu1 %vm654_vm5, %v960_v0  ;;  %vm751_vm5 = vcmask 60416  }
 0x46e   : > { %1089 = vmatpush.bf16.msrb.mxu0 %v1425_v10 }
 0x4cf   : > { %v814_v29 = vpop.xlane.xlu2 %813 }
 0x4d0   : > { %1547 = vrcp.f32 %v814_v29  ;;  %v846_v51 = vand.u32 2147483647, %v814_v29  ;;  %v848_v52 = vand.u32 2147483648, %v814_v29  ;;  %vm842_vm12 = vweird.f32 %v814_v29 }
 0x4d2   : > { %vm847_vm15 = vcmp.eq.f32.partialorder %v846_v51, 8.507059e+37  ;;  %v849_v61 = vor.u32 1.1754944e-38, %v848_v52 }
 0x4d6   : > { %v1548_v33 = vpop.eup %1547 }
 0x4d7   : > { %v838_v34 = vmul.f32 %v1548_v33, %v814_v29  ;;  %vm843_vm9 = vweird.f32 %v1548_v33 }
 0x4d8   : > { %vm844_vm14 = vmor %vm842_vm12, %vm843_vm9  ;;  %vm1057_vm12 = vcmask 257216  }
 0x4d9   : > { %v839_v38 = vsub.f32 1.0, %v838_v34 }
 0x4da   : > { %v2060_v14 = vpop.f32.mrf.mxu1 }
 0x4db   : > { %v1001_v15 = vpop.f32.mrf.mxu2  ;;  %v840_v42 = vmul.f32 %v1548_v33, %v839_v38 }
 0x4dd   : > { %v841_v47 = vadd.f32 %v1548_v33, %v840_v42 }
 0x4df   : > { %v845_v58 = vsel %vm844_vm14, %v1548_v33, %v841_v47  ;;  %v1533_v33 = vld [vmem:[%s2149_s9] ss:$0 sm:$0xff] }
 0x4e0   : > { %v850_v2 = vsel %vm847_vm15, %v849_v61, %v845_v58  ;;  %v1535_v58 = vld [vmem:[%s2151_s11] ss:$0 sm:$0xff] }
 0x4e1   : > { %v851_v5 = vmul.f32 %v850_v2, %v2060_v14 }
 0x4e2   : > { %v835_v16 = vpop.f32.mrf.mxu1 }
 0x4e3   : > { %v1003_v17 = vpop.f32.mrf.mxu2  ;;  %v852_v8 = vpack.c.bf16 %v851_v5, %v851_v5 }
 0x4ea   : > { %v933_v18 = vpop.f32.mrf.mxu0  ;;  %v978_v19 = vpop.f32.mrf.mxu1 }
 0x4eb   : > { %v1002_v20 = vadd.f32 %v1001_v15, %v978_v19 }
 0x4ed   : > { %v1005_v21 = vadd.f32 %v1002_v20, %v2025_v25 }
 0x4ef   : > { %v1006_v22 = vsel %vm699_vm7, %v1005_v21, -inf }
 0x4f0   : > { %1007 = vmax.xlane.f32.xlu0 %v1006_v22 }
 0x4f2   : > { %v935_v23 = vpop.f32.mrf.mxu0  ;;  %v980_v24 = vpop.f32.mrf.mxu1 }
 0x4f8   : > { %913 = vadd.xlane.f32.xlu0 %v912_v27 }
 0x500   : > { %707 = vadd.xlane.f32.xlu0 %v706_v28 }
 0x563   : > { %v1008_v30 = vpop.xlane.xlu0 %1007 }
 0x564   : > { %v1009_v31 = vsub.f32 %v1005_v21, %v1008_v30  ;;  %v1424_v30 = vld [vmem:[%s2148_s8] sm:$0xff] }
 0x565   : > { %1090 = vmatpush.bf16.msrb.mxu0 %v1424_v30 }
 0x566   : > { %v1010_v32 = vmul.f32 1.442695, %v1009_v31 }
 0x568   : > { %1549 = vpow2.f32 %v1010_v32 }
 0x56b   : > { %v914_v25 = vpop.xlane.xlu0 %913 }
 0x56c   : > { %1551 = vrcp.f32 %v914_v25  ;;  %v948_v44 = vand.u32 2147483648, %v914_v25  ;;  %v946_v46 = vand.u32 2147483647, %v914_v25  ;;  %vm942_vm10 = vweird.f32 %v914_v25 }
 0x56e   : > { %v1550_v35 = vpop.eup %1549  ;;  %v949_v53 = vor.u32 1.1754944e-38, %v948_v44  ;;  %vm947_vm13 = vcmp.eq.f32.partialorder %v946_v46, 8.507059e+37 }
 0x56f   : > { %v1015_v36 = vpack.c.bf16 %v1550_v35, %v1550_v35  ;;  %v1012_v37 = vsel %vm699_vm7, %v1550_v35, 0.0 }
 0x570   : > { %1013 = vadd.xlane.f32.xlu1 %v1012_v37 }
 0x571   : > { %1381 = vmatmul.msk.bf16.vlgmr.msrb.gmra.mxu3 %vm699_vm7, %v1015_v36 }
 0x572   : > { %v1552_v39 = vpop.eup %1551 }
 0x573   : > { %v938_v40 = vmul.f32 %v1552_v39, %v914_v25  ;;  %v708_v41 = vpop.xlane.xlu0 %707  ;;  %vm943_vm8 = vweird.f32 %v1552_v39 }
 0x574   : > { %1553 = vrcp.f32 %v708_v41  ;;  %vm944_vm11 = vmor %vm942_vm10, %vm943_vm8  ;;  %v746_v62 = vand.u32 2147483648, %v708_v41  ;;  %v744_v0 = vand.u32 2147483647, %v708_v41  ;;  %vm740_vm2 = vweird.f32 %v708_v41 }
 0x575   : > { %v939_v43 = vsub.f32 1.0, %v938_v40  ;;  %vm857_vm10 = vcmask 126016   ;;  %v1426_v40 = vld [vmem:[#allocation9] sm:$0xff] }
 0x576   : > { %v747_v4 = vor.u32 1.1754944e-38, %v746_v62  ;;  %vm745_vm4 = vcmp.eq.f32.partialorder %v744_v0, 8.507059e+37 }
 0x577   : > { %v940_v45 = vmul.f32 %v1552_v39, %v939_v43 }
 0x579   : > { %v941_v49 = vadd.f32 %v1552_v39, %v940_v45 }
 0x57a   : > { %v1554_v50 = vpop.eup %1553 }
 0x57b   : > { %v736_v54 = vmul.f32 %v1554_v50, %v708_v41  ;;  %v945_v55 = vsel %vm944_vm11, %v1552_v39, %v941_v49  ;;  %vm741_vm1 = vweird.f32 %v1554_v50  ;;  %vm957_vm11 = vcmask 191616   ;;  %v1427_v39 = vld [vmem:[#allocation9 + $0x8] sm:$0xff] }
 0x57c   : > { %v950_v57 = vsel %vm947_vm13, %v949_v53, %v945_v55  ;;  %vm742_vm3 = vmor %vm740_vm2, %vm741_vm1  ;;  %1149 = vmatpush.bf16.msrb.mxu1 %v1427_v39  ;;  %v1430_v55 = vld [vmem:[%s2152_s12 + $0x10] sm:$0xff] }
 0x57d   : > { %v737_v59 = vsub.f32 1.0, %v736_v54  ;;  %v951_v60 = vmul.f32 %v950_v57, %v933_v18  ;;  %v1429_v57 = vld [vmem:[%s2152_s12 + $0x8] sm:$0xff] }
 0x57f   : > { %v738_v63 = vmul.f32 %v1554_v50, %v737_v59  ;;  %v952_v1 = vpack.c.bf16 %v951_v60, %v951_v60  ;;  %v1428_v59 = vld [vmem:[%s2152_s12] sm:$0xff] }
 0x580   : > { %1150 = vmatpush.bf16.msrb.mxu1 %v1426_v40 }
 0x581   : > { %v739_v3 = vadd.f32 %v1554_v50, %v738_v63  ;;  %954 = vrot.lane.b32.xlu0 %v952_v1, %s1769_s1  ;;  %s1419_s1 = sshll.u32 %s1878_s17, 3  ;;  %s1232_s17 = scalar_lea.sflag [#allocation5], %s517_s24 }
 0x582   : > { %s1242_s15 = scalar_lea.hbm %s2154_s14, %s1419_s1 }
 0x583   : > { %v743_v6 = vsel %vm742_vm3, %v1554_v50, %v739_v3  ;;  %v1534_v50 = vld [vmem:[%s2145_s5] ss:$0 sm:$0xff]  ;;  %s1246_s18 = sshll.u32 %s1242_s15, 4  ;;  %s1247_s18 = int_to_ptr.hbm [resolvable:$true] %s1246_s18 }
 0x584   : > { %v748_v7 = vsel %vm745_vm4, %v747_v4, %v743_v6  ;;  %s1697_s22 = sshra.s32 %s1247_s18, 4  ;;  %s1698_s22 = int_to_ptr.hbm [resolvable:$true] %s1697_s22 }
 0x585   : > { %v749_v56 = vmul.f32 %v748_v7, %v2042_v48  ;;  %p1704_p3 = scmp.lt.s32.totalorder %s1698_s22, %s2154_s14 }
 0x587   : > { %v750_v9 = vpack.c.bf16 %v749_v56, %v749_v56 }
 0x589   : > { %854 = vrot.lane.b32.xlu1 %v852_v8, %s1780_s20  ;;  %752 = vst.msk [vmem:[#allocation2] sm:$0xf] %vm751_vm5, %v750_v9  ;;  %vm1213_vm5 = vcmask 523264   ;;  %s1699_s20 = scalar_lea.hbm %s1698_s22, 8 }
 0x58a   : > { %p1700_p0 = scmp.ne.s32.totalorder %s1698_s22, %s1699_s20 }
 0x58c   : > { %p1701_p1 = pnand %p1700_p0, %p1895_p5 }
 0x58e   : > { %p1702_p2 = pneg %p1701_p1 }
 0x5e3   : > { %v1014_v11 = vpop.xlane.xlu1 %1013 }
 0x5e4   : > { %1555 = vrcp.f32 %v1014_v11  ;;  %v1048_v16 = vand.u32 2147483648, %v1014_v11  ;;  %v1046_v48 = vand.u32 2147483647, %v1014_v11  ;;  %vm1042_vm7 = vweird.f32 %v1014_v11 }
 0x5e6   : > { %v1049_v19 = vor.u32 1.1754944e-38, %v1048_v16  ;;  %vm1047_vm9 = vcmp.eq.f32.partialorder %v1046_v48, 8.507059e+37 }
 0x5ea   : > { %v1556_v12 = vpop.eup %1555 }
 0x5eb   : > { %v1038_v14 = vmul.f32 %v1556_v12, %v1014_v11  ;;  %vm1043_vm6 = vweird.f32 %v1556_v12 }
 0x5ec   : > { %vm1044_vm8 = vmor %vm1042_vm7, %vm1043_vm6 }
 0x5ed   : > { %v1039_v15 = vsub.f32 1.0, %v1038_v14  ;;  %v1536_v14 = vld [vmem:[%s2153_s13] ss:$0 sm:$0xff] }
 0x5ef   : > { %v1040_v17 = vmul.f32 %v1556_v12, %v1039_v15 }
 0x5f1   : > { %v1041_v18 = vadd.f32 %v1556_v12, %v1040_v17 }
 0x5f3   : > { %v1045_v20 = vsel %vm1044_vm8, %v1556_v12, %v1041_v18  ;;  %v955_v28 = vpop.permute.xlu0 %954 }
 0x5f4   : > { %v1033_v21 = vpop.f32.mrf.mxu3  ;;  %v1050_v22 = vsel %vm1047_vm9, %v1049_v19, %v1045_v20 }
 0x5f5   : > { %v1051_v23 = vmul.f32 %v1050_v22, %v1033_v21 }
 0x5f7   : > { %v1052_v24 = vpack.c.bf16 %v1051_v23, %v1051_v23 }
 0x5f9   : > { %1054 = vrot.lane.b32.xlu2 %v1052_v24, %s1781_s27  ;;  %s1703_s27 = scalar_lea.hbm %s2154_s14, 16 }
 0x5fa   : > { %p1705_p4 = scmp.lt.s32.totalorder %s1703_s27, %s1699_s20 }
 0x5fb   : > { %v855_v27 = vpop.permute.xlu1 %854 }
 0x5fc   : > { %858 = vst.msk [vmem:[#allocation2] sm:$0xf] %vm857_vm10, %v855_v27  ;;  %v1035_v29 = vpop.f32.mrf.mxu3  ;;  %p1706_p7 = por %p1705_p4, %p1704_p3 }
 0x5fd   : > { %958 = vst.msk [vmem:[#allocation2] sm:$0xf] %vm957_vm11, %v955_v28 }
 0x5fe   : > { %p1707_p8 = pnand %p1706_p7, %p1702_p2 }
 0x653   : > { %v1055_v31 = vpop.permute.xlu2 %1054 }
 0x654   : > { %1058 = vst.msk [vmem:[#allocation2] sm:$0xf] %vm1057_vm12, %v1055_v31 }
 0x65b   : > { %v1059_v32 = vld [vmem:[#allocation2] sm:$0xf] }
 0x65c   : > { %1390 = vmatmul.msk.bf16.vlgmr.msrb.gmra.mxu0 %vm528_vm0, %v1059_v32 }
 0x6d9   : > { %v1092_v25 = vpop.f32.mrf.mxu0 }
 0x6da   : > { %v1093_v34 = vadd.f32 %v1533_v33, %v1092_v25 }
 0x6dc   : > { %v1096_v35 = vadd.f32 %v1093_v34, %v1980_v26 }
 0x6de   : > { %v1098_v36 = vmul.f32 %v1096_v35, %v1096_v35 }
 0x6e0   : > { %v1099_v37 = vsel %vm528_vm0, %v1098_v36, 0.0 }
 0x6e1   : > { %v1094_v38 = vpop.f32.mrf.mxu0  ;;  %1100 = vadd.xlane.f32.xlu0 %v1099_v37 }
 0x754   : > { %v1101_v41 = vpop.xlane.xlu0 %1100 }
 0x755   : > { %v1102_v42 = vmul.f32 %v1101_v41, %v1968_v13  ;;  %v1431_v13 = vld [vmem:[%s2152_s12 + $0x18] sm:$0xff] }
 0x756   : > { %1221 = vmatpush.bf16.msrb.mxu2 %v1431_v13 }
 0x757   : > { %v1103_v43 = vadd.f32 1.1920929e-07, %v1102_v42 }
 0x759   : > { %1557 = vrsqrt.f32 %v1103_v43  ;;  %vm1110_vm14 = vweird.f32 %v1103_v43 }
 0x75a   : > { %1222 = vmatpush.bf16.msrb.mxu2 %v1430_v55 }
 0x75e   : > { %1223 = vmatpush.bf16.msrb.mxu2 %v1429_v57 }
 0x75f   : > { %v1558_v44 = vpop.eup %1557 }
 0x760   : > { %v1105_v45 = vmul.f32 %v1558_v44, %v1103_v43  ;;  %vm1111_vm13 = vweird.f32 %v1558_v44 }
 0x761   : > { %vm1112_vm15 = vmor %vm1110_vm14, %vm1111_vm13 }
 0x762   : > { %v1106_v46 = vmul.f32 %v1558_v44, %v1105_v45  ;;  %1224 = vmatpush.bf16.msrb.mxu2 %v1428_v59 }
 0x764   : > { %v1107_v47 = vmul.f32 0.5, %v1106_v46 }
 0x766   : > { %v1108_v49 = vsub.f32 1.5, %v1107_v47 }
 0x768   : > { %v1109_v26 = vmul.f32 %v1558_v44, %v1108_v49 }
 0x76a   : > { %v1113_v51 = vsel %vm1112_vm15, %v1558_v44, %v1109_v26 }
 0x76b   : > { %v1114_v52 = vmul.f32 %v1113_v51, %v1096_v35 }
 0x76d   : > { %v1118_v53 = vmul.f32 %v1534_v50, %v1114_v52 }
 0x76f   : > { %v1119_v54 = vpack.c.bf16 %v1118_v53, %v1118_v53 }
 0x771   : > { %1399 = vmatmul.msk.bf16.vlgmr.msrb.gmra.mxu1 %vm528_vm0, %v1119_v54 }
 0x7ee   : > { %v1152_v60 = vpop.f32.mrf.mxu1 }
 0x7ef   : > { %v1153_v61 = vadd.f32 %v1535_v58, %v1152_v60 }
 0x7f1   : > { %v1400_v62 = vmul.f32 -1.442695, %v1153_v61 }
 0x7f3   : > { %1559 = vpow2.f32 %v1400_v62 }
 0x7f6   : > { %v1154_v63 = vpop.f32.mrf.mxu1 }
 0x7f9   : > { %v1560_v0 = vpop.eup %1559 }
 0x7fa   : > { %v1159_v1 = vadd.f32 1.0, %v1560_v0 }
 0x7fc   : > { %1561 = vrcp.f32 %v1159_v1  ;;  %v1171_v5 = vand.u32 2147483648, %v1159_v1  ;;  %v1169_v7 = vand.u32 2147483647, %v1159_v1  ;;  %vm1165_vm2 = vweird.f32 %v1159_v1 }
 0x7fe   : > { %v1172_v8 = vor.u32 1.1754944e-38, %v1171_v5  ;;  %vm1170_vm4 = vcmp.eq.f32.partialorder %v1169_v7, 8.507059e+37 }
 0x802   : > { %v1562_v2 = vpop.eup %1561 }
 0x803   : > { %v1161_v3 = vmul.f32 %v1562_v2, %v1159_v1  ;;  %vm1166_vm1 = vweird.f32 %v1562_v2 }
 0x804   : > { %vm1167_vm3 = vmor %vm1165_vm2, %vm1166_vm1 }
 0x805   : > { %v1162_v4 = vsub.f32 1.0, %v1161_v3 }
 0x807   : > { %v1163_v6 = vmul.f32 %v1562_v2, %v1162_v4 }
 0x809   : > { %v1164_v56 = vadd.f32 %v1562_v2, %v1163_v6 }
 0x80b   : > { %v1168_v9 = vsel %vm1167_vm3, %v1562_v2, %v1164_v56 }
 0x80c   : > { %v1173_v10 = vsel %vm1170_vm4, %v1172_v8, %v1168_v9 }
 0x80d   : > { %v1175_v11 = vmul.f32 %v1173_v10, %v1153_v61 }
 0x80f   : > { %v1176_v12 = vpack.c.bf16 %v1175_v11, %v1175_v11 }
 0x811   : > { %1417 = vmatmul.msk.bf16.vlgmr.msrb.gmra.mxu2 %vm1213_vm5, %v1176_v12 }
 0x894   : > { %v1226_v15 = vpop.f32.mrf.mxu2 }
 0x895   : > { %v1227_v16 = vadd.f32 %v1536_v14, %v1226_v15 }
 0x897   : > { %1230 = vst.msk [vmem:[%s519_s25] sm:$0xff] %vm528_vm0, %v1227_v16 }
 0x898   : > { %1710 = shalt.err (!%p1707_p8)
}
 0x899   : > { %1448 = dma.vmem_to_hbm [thread:$0]  (%p1895_p5), %s1245_s28, 128, %s1247_s18, %s1232_s17  }
 0x89c   : > { %v1228_v17 = vpop.f32.mrf.mxu2 }
 0x89d PF: > { %s2177_s24 = sld [smem:[#allocation18_spill]] }
 0x89e   : > { %s2178_s3 = sld [smem:[#allocation16_spill]] }
 0x8a3   : > { %p1475_p9 = scmp.ge.s32.totalorder %s2177_s24, 2 }
 0x8a4   : > { %s1258_s15 = sand.u32 1, %s2178_s3  }
 0x8a5   : > { %p1464_p10 = pnand %p1475_p9, %p1899_p6  ;;  %s1259_s16 = scalar_lea.sflag [#allocation5], %s1258_s15 }
 0x8a7   : > { %p1465_p11 = pneg %p1464_p10 }
 0x8a9   : > { %1740 = dma.done.wait (%p1465_p11), %s1259_s16, 128  }
 0x8aa   : > { %1742 = vsyncadd (%p1465_p11), %s1259_s16, 4294967168  ;;  %s2180_s16 = sld [smem:[#allocation19_spill]]  ;;  %s2183_s29 = smov %s1749_s30 }
 0x8ab   : > { %s2181_s19 = sld [smem:[#allocation17_spill]] }
 0x8ac   : > { %s2182_s15 = sld [smem:[#allocation20_spill]] }
 0x8b0   : > { %p27_p12 = scmp.ge.s32.totalorder %s2180_s16, 4  }
 0x8b1   : > { %s2184_s30 = smov %s2181_s19 }
 0x8b2   :  { %29 = sbr.rel (!%p27_p12) target bundleno = 10 (0xa), region = 128 }
 0x8b7   :  { %1265 = vsyncpa [#allocation4], 1 }
 0x8b8   :  { %1267 = vsyncpa [#allocation4 + $0x1], 1 }
 0x8b9   :  { %1268 = vsyncpa [#allocation7], 1 }
 0x8ba   :  { %1269 = vsyncpa [#allocation10], 1 }
 0x8bb   :  { %1270 = vsyncpa [#allocation5], 1 }
 0x8bc   :  { %1272 = vsyncpa [#allocation5 + $0x1], 1 }

</bundles_post_ra>
